<compile_context>
chip_gen: v7x
topology: tpu7x:2x2x1
jax: 0.10.0
libtpu: 0.0.40
codegen_flags: <defaults>
</compile_context>

<pallas_src>
import jax
import jax.numpy as jnp
from jax import lax
from jax.experimental import pallas as pl
from jax.experimental.pallas import tpu as pltpu


_LANE = 128
_STATIC_LOOP_MAX = 32     # chunks up to this many timesteps use a fully static loop


def _round_up(x, m):
    return (x + m - 1) // m * m


# --------------------------------------------------------------------------- kernel
def gru_chunk_kernel(x_ref, w_ih_ref, w_hh_ref, b_ref, b_hn_ref,
                     out_ref, gi_ref, h_ref):
    """One chunk of the GRU recurrence (PyTorch gate order r, z, n).

    x_ref    : (t_chunk*B, I)    time-major input rows for this chunk (row = t*B + b)
    w_ih_ref : (I,  3*Hp)        packed [W_ir^T | W_iz^T | W_in^T]; gate g at cols [g*Hp, g*Hp+H)
    w_hh_ref : (Hp, 3*Hp)        packed [W_hr^T | W_hz^T | W_hn^T]
    b_ref    : (1,  3*Hp)        b_ih (+ b_hh for r,z gates) packed the same way
    b_hn_ref : (1,  Hp)          hidden bias of the n gate (cannot be folded)
    out_ref  : (t_chunk, B, Hp)  hidden states for this chunk (time-major, lane-padded)
    gi_ref   : (t_chunk*B, 3*Hp) VMEM scratch: chunk input-path pre-activations
    h_ref    : (B, Hp)           VMEM scratch carrying h across chunks
    """
    tc, B, Hp = out_ref.shape

    # h0 = zeros, matching the module's torch.zeros(...) initial hidden state.
    @pl.when(pl.program_id(0) == 0)
    def _():
        h_ref[...] = jnp.zeros_like(h_ref)

    # (1) Input projection for the whole chunk: ONE big MXU matmul (all timesteps of
    #     the chunk at once) with the folded biases added here.  No HBM round-trip
    #     of the (S, B, 3H) activation tensor.
    gi_ref[...] = (
        jnp.dot(x_ref[...], w_ih_ref[...], preferred_element_type=jnp.float32)
        + b_ref[...]
    )

    w_hh = w_hh_ref[...]      # (Hp, 3*Hp) — VMEM-resident, small (<= ~7 MB at H=768)
    b_hn = b_hn_ref[...]      # (1, Hp)

    # (2) Serial recurrence: one fused, lane-aligned hidden matmul per step; gate
    #     slices are static multiples of 128 lanes; output stores are lane-dense.
    def step(t, h):
        g = gi_ref[pl.ds(t * B, B), :]                               # (B, 3*Hp)
        gh = jnp.dot(h, w_hh, preferred_element_type=jnp.float32)    # (B, 3*Hp)
        r = jax.nn.sigmoid(g[:, :Hp] + gh[:, :Hp])
        z = jax.nn.sigmoid(g[:, Hp:2 * Hp] + gh[:, Hp:2 * Hp])
        n = jnp.tanh(g[:, 2 * Hp:] + r * (gh[:, 2 * Hp:] + b_hn))
        h_new = (1.0 - z) * n + z * h
        out_ref[t] = h_new.astype(out_ref.dtype)
        return h_new

    if tc <= _STATIC_LOOP_MAX:
        # Short chunk: fully static loop (all slices static -> simplest lowering).
        h = h_ref[...]
        for t in range(tc):
            h = step(t, h)
        h_ref[...] = h
    else:
        # Long chunk: partial unroll keeps LLO scheduling visibility without
        # blowing the 64-vreg budget (full unroll + hoisted weights would spill).
        h_ref[...] = lax.fori_loop(0, tc, step, h_ref[...], unroll=4)


# --------------------------------------------------------------------------- packing
def _pack_gate_cols(w, H, Hp, rows):
    """w: (3H, D) torch GRU layout -> (rows, 3*Hp) = [W_r^T | W_z^T | W_n^T] with each
    gate's H columns placed at a 128-lane boundary, zeros elsewhere."""
    D = w.shape[1]
    out = jnp.zeros((rows, 3 * Hp), jnp.float32)
    for g in range(3):
        blk = jnp.transpose(w[g * H:(g + 1) * H, :]).astype(jnp.float32)   # (D, H)
        out = out.at[:D, g * Hp:g * Hp + H].set(blk)
    return out


def _pack_gate_bias(b_ih, b_hh, H, Hp):
    b = jnp.zeros((1, 3 * Hp), jnp.float32)
    b = b.at[0, 0 * Hp:0 * Hp + H].set(b_ih[0 * H:1 * H] + b_hh[0 * H:1 * H])   # r
    b = b.at[0, 1 * Hp:1 * Hp + H].set(b_ih[1 * H:2 * H] + b_hh[1 * H:2 * H])   # z
    b = b.at[0, 2 * Hp:2 * Hp + H].set(b_ih[2 * H:3 * H])                        # n (input part)
    b_hn = jnp.zeros((1, Hp), jnp.float32).at[0, :H].set(b_hh[2 * H:3 * H])
    return b, b_hn


def _pick_t_chunk(S, B):
    """>=4 chunks for real prefetch/writeback overlap on long sequences; chunk row
    blocks must be 8-sublane aligned (or the whole sequence) per the (8,128) rule."""
    if S <= 32:
        return S
    for n_chunks in (8, 4, 2):
        tc = S // n_chunks
        if S % n_chunks == 0 and (tc * B) % 8 == 0:
            return tc
    return S


# --------------------------------------------------------------------------- pallas_call
def gru_pallas(x_tm, w_ih_p, w_hh_p, b_p, b_hn_p, *, S, B, Hp, t_chunk=None):
    """x_tm: (S*B, I) time-major rows.  Returns (S, B, Hp) hidden states."""
    I = x_tm.shape[1]
    if t_chunk is None:
        t_chunk = _pick_t_chunk(S, B)
    assert S % t_chunk == 0, "t_chunk must divide the sequence length"
    n_chunks = S // t_chunk
    assert n_chunks == 1 or (t_chunk * B) % 8 == 0, (
        "chunked input blocks need an 8-sublane-aligned row count")

    return pl.pallas_call(
        gru_chunk_kernel,
        out_shape=jax.ShapeDtypeStruct((S, B, Hp), jnp.float32),
        grid_spec=pltpu.PrefetchScalarGridSpec(
            num_scalar_prefetch=0,
            grid=(n_chunks,),
            in_specs=[
                pl.BlockSpec((t_chunk * B, I), lambda c: (c, 0)),   # input rows (pipelined)
                pl.BlockSpec((I, 3 * Hp), lambda c: (0, 0)),        # W_ih packed (stationary)
                pl.BlockSpec((Hp, 3 * Hp), lambda c: (0, 0)),       # W_hh packed (stationary)
                pl.BlockSpec((1, 3 * Hp), lambda c: (0, 0)),        # fused bias
                pl.BlockSpec((1, Hp), lambda c: (0, 0)),            # b_hn
            ],
            out_specs=pl.BlockSpec((t_chunk, B, Hp), lambda c: (c, 0, 0)),
            scratch_shapes=[
                pltpu.VMEM((t_chunk * B, 3 * Hp), jnp.float32),     # chunk gi
                pltpu.VMEM((B, Hp), jnp.float32),                   # carried hidden state
            ],
        ),
        compiler_params=pltpu.CompilerParams(
            dimension_semantics=("arbitrary",),   # recurrence: chunks run in order
        ),
    )(x_tm, w_ih_p, w_hh_p, b_p, b_hn_p)


# --------------------------------------------------------------------------- wrapper
def basebone_forward(img, w_ih, w_hh, b_ih, b_hh, *, t_chunk=None):
    """img: (B, S, I) batch-major (like the PyTorch module's input).
    w_ih: (3H, I), w_hh: (3H, H), b_ih/b_hh: (3H,) in torch.nn.GRU layout.
    Returns (B, S, H)."""
    B, S, I = img.shape
    H = w_hh.shape[1]
    assert w_ih.shape == (3 * H, I) and w_hh.shape == (3 * H, H)
    Hp = _round_up(H, _LANE)

    # Pack per-gate weights/biases at 128-lane boundaries (tiny one-time cost; a
    # no-op layout-wise when H is already a multiple of 128, e.g. the module's 768).
    w_ih_p = _pack_gate_cols(w_ih, H, Hp, rows=I)      # (I,  3*Hp)
    w_hh_p = _pack_gate_cols(w_hh, H, Hp, rows=Hp)     # (Hp, 3*Hp)
    b_p, b_hn_p = _pack_gate_bias(b_ih, b_hh, H, Hp)

    # Time-major 2-D input rows (row = t*B + b).  This single transpose pass replaces
    # the previous (S, B, 3H) gi HBM round-trip; the projection now runs in-kernel.
    x_tm = jnp.transpose(img, (1, 0, 2)).reshape(S * B, I).astype(jnp.float32)

    out_tm = gru_pallas(x_tm, w_ih_p, w_hh_p, b_p, b_hn_p,
                        S=S, B=B, Hp=Hp, t_chunk=t_chunk)            # (S, B, Hp)

    # Back to batch-major and drop the lane padding (no-op slice when H % 128 == 0).
    return jnp.transpose(out_tm[:, :, :H], (1, 0, 2))                # (B, S, H)


# --------------------------------------------------------------------------- reference
def gru_reference(img, w_ih, w_hh, b_ih, b_hh):
    """Pure-JAX reference (lax.scan) matching torch.nn.GRU semantics."""
    B, S, I = img.shape
    H = w_hh.shape[1]
    x_tm = jnp.transpose(img, (1, 0, 2))
    h0 = jnp.zeros((B, H), jnp.float32)
    hp = jax.lax.Precision.HIGHEST

    def step(h_prev, x_t):
        gi = jnp.dot(x_t, w_ih.T, precision=hp) + b_ih
        gh = jnp.dot(h_prev, w_hh.T, precision=hp) + b_hh
        i_r, i_z, i_n = gi[:, :H], gi[:, H:2 * H], gi[:, 2 * H:]
        h_r, h_z, h_n = gh[:, :H], gh[:, H:2 * H], gh[:, 2 * H:]
        r = jax.nn.sigmoid(i_r + h_r)
        z = jax.nn.sigmoid(i_z + h_z)
        n = jnp.tanh(i_n + r * h_n)
        h_new = (1.0 - z) * n + z * h_prev
        return h_new, h_new

    _, outs = jax.lax.scan(step, h0, x_tm)
    return jnp.transpose(outs, (1, 0, 2))


if __name__ == "__main__":
    # Small shapes consistent with the module (nn.GRU(input_size, hidden_size)).
    B, S, I, H = 2, 8, 64, 32

    key = jax.random.PRNGKey(0)
    k_img, k_wih, k_whh, k_bih, k_bhh = jax.random.split(key, 5)

    bound = 1.0 / (H ** 0.5)   # PyTorch GRU default init range
    img = jax.random.normal(k_img, (B, S, I), jnp.float32)
    w_ih = jax.random.uniform(k_wih, (3 * H, I), jnp.float32, -bound, bound)
    w_hh = jax.random.uniform(k_whh, (3 * H, H), jnp.float32, -bound, bound)
    b_ih = jax.random.uniform(k_bih, (3 * H,), jnp.float32, -bound, bound)
    b_hh = jax.random.uniform(k_bhh, (3 * H,), jnp.float32, -bound, bound)

    fwd = jax.jit(basebone_forward)
    out = jax.block_until_ready(fwd(img, w_ih, w_hh, b_ih, b_hh))

    ref = gru_reference(img, w_ih, w_hh, b_ih, b_hh)
    assert out.shape == (B, S, H)
    # 2e-4: in-kernel MXU dots use default (full f32) precision, reference uses HIGHEST.
    assert jnp.allclose(out, ref, atol=2e-4, rtol=2e-4), "mismatch vs JAX reference"

    print("KERNEL_OK")
</pallas_src>

<mosaic_0001>
module attributes {stable_mosaic.version = 11 : i64} {
  func.func @gru_chunk_kernel(%arg0: i32, %arg1: memref<16x64xf32, #tpu.memory_space<vmem>>, %arg2: memref<64x384xf32, #tpu.memory_space<vmem>>, %arg3: memref<128x384xf32, #tpu.memory_space<vmem>>, %arg4: memref<1x384xf32, #tpu.memory_space<vmem>>, %arg5: memref<1x128xf32, #tpu.memory_space<vmem>>, %arg6: memref<8x2x128xf32, #tpu.memory_space<vmem>>, %arg7: memref<16x384xf32, #tpu.memory_space<vmem>>, %arg8: memref<2x128xf32, #tpu.memory_space<vmem>>) attributes {dimension_semantics = [#tpu.dimension_semantics<arbitrary>], iteration_bounds = array<i64: 1>, scalar_prefetch = 0 : i64, scratch_operands = 2 : i64, tpu.core_type = #tpu.core_type<tc>, window_params = [{transform_indices = @transform_0, window_bounds = array<i64: 16, 64>}, {pipeline_mode = #tpu.pipeline_mode<synchronous>, transform_indices = @transform_1, window_bounds = array<i64: 64, 384>}, {pipeline_mode = #tpu.pipeline_mode<synchronous>, transform_indices = @transform_2, window_bounds = array<i64: 128, 384>}, {pipeline_mode = #tpu.pipeline_mode<synchronous>, transform_indices = @transform_3, window_bounds = array<i64: 1, 384>}, {pipeline_mode = #tpu.pipeline_mode<synchronous>, transform_indices = @transform_4, window_bounds = array<i64: 1, 128>}, {transform_indices = @transform_5, window_bounds = array<i64: 8, 2, 128>}]} {
    %c0_i32 = arith.constant 0 : i32
    %0 = arith.cmpi eq, %arg0, %c0_i32 : i32
    %1 = arith.extui %0 : i1 to i32
    %c0_i32_0 = arith.constant 0 : i32
    %2 = arith.cmpi ne, %1, %c0_i32_0 : i32
    scf.if %2 {
      %cst_77 = arith.constant 0.000000e+00 : f32
      %278 = vector.broadcast %cst_77 : f32 to vector<2x128xf32>
      %c0_78 = arith.constant 0 : index
      %c0_79 = arith.constant 0 : index
      %279 = vector.load %arg8[%c0_78, %c0_79] : memref<2x128xf32, #tpu.memory_space<vmem>>, vector<2x128xf32>
      tpu.vector_store %arg8[%c0_78, %c0_79], %278 {strides = array<i32>} : memref<2x128xf32, #tpu.memory_space<vmem>>, vector<2x128xf32>,
    } else {
    }
    %c0 = arith.constant 0 : index
    %c0_1 = arith.constant 0 : index
    %3 = vector.load %arg1[%c0, %c0_1] : memref<16x64xf32, #tpu.memory_space<vmem>>, vector<16x64xf32>
    %c0_2 = arith.constant 0 : index
    %c0_3 = arith.constant 0 : index
    %4 = vector.load %arg2[%c0_2, %c0_3] : memref<64x384xf32, #tpu.memory_space<vmem>>, vector<64x384xf32>
    %cst = arith.constant dense<0.000000e+00> : vector<16x384xf32>
    %5 = tpu.matmul %3, %4, %cst {dimension_numbers = #tpu.dot_dimension_numbers<[1], [0], [0], [1], [0, 0, 1, 1], [], []>} : vector<16x64xf32>, vector<64x384xf32>, vector<16x384xf32> -> vector<16x384xf32>
    %c0_4 = arith.constant 0 : index
    %c0_5 = arith.constant 0 : index
    %6 = vector.load %arg4[%c0_4, %c0_5] : memref<1x384xf32, #tpu.memory_space<vmem>>, vector<1x384xf32>
    %7 = vector.broadcast %6 : vector<1x384xf32> to vector<16x384xf32>
    %8 = arith.addf %5, %7 : vector<16x384xf32>
    %c0_6 = arith.constant 0 : index
    %c0_7 = arith.constant 0 : index
    %9 = vector.load %arg7[%c0_6, %c0_7] : memref<16x384xf32, #tpu.memory_space<vmem>>, vector<16x384xf32>
    tpu.vector_store %arg7[%c0_6, %c0_7], %8 {strides = array<i32>} : memref<16x384xf32, #tpu.memory_space<vmem>>, vector<16x384xf32>,
    %c0_8 = arith.constant 0 : index
    %c0_9 = arith.constant 0 : index
    %10 = vector.load %arg3[%c0_8, %c0_9] : memref<128x384xf32, #tpu.memory_space<vmem>>, vector<128x384xf32>
    %c0_10 = arith.constant 0 : index
    %c0_11 = arith.constant 0 : index
    %11 = vector.load %arg5[%c0_10, %c0_11] : memref<1x128xf32, #tpu.memory_space<vmem>>, vector<1x128xf32>
    %c0_12 = arith.constant 0 : index
    %c0_13 = arith.constant 0 : index
    %12 = vector.load %arg8[%c0_12, %c0_13] : memref<2x128xf32, #tpu.memory_space<vmem>>, vector<2x128xf32>
    %c0_14 = arith.constant 0 : index
    %c0_15 = arith.constant 0 : index
    %13 = vector.load %arg7[%c0_14, %c0_15] : memref<16x384xf32, #tpu.memory_space<vmem>>, vector<2x384xf32>
    %cst_16 = arith.constant dense<0.000000e+00> : vector<2x384xf32>
    %14 = tpu.matmul %12, %10, %cst_16 {dimension_numbers = #tpu.dot_dimension_numbers<[1], [0], [0], [1], [0, 0, 1, 1], [], []>} : vector<2x128xf32>, vector<128x384xf32>, vector<2x384xf32> -> vector<2x384xf32>
    %15 = vector.extract_strided_slice %13 {offsets = [0, 0], sizes = [2, 128], strides = [1, 1]} : vector<2x384xf32> to vector<2x128xf32>
    %16 = vector.extract_strided_slice %14 {offsets = [0, 0], sizes = [2, 128], strides = [1, 1]} : vector<2x384xf32> to vector<2x128xf32>
    %17 = arith.addf %15, %16 : vector<2x128xf32>
    %18 = arith.negf %17 : vector<2x128xf32>
    %19 = math.exp %18 : vector<2x128xf32>
    %cst_17 = arith.constant 1.000000e+00 : f32
    %20 = vector.broadcast %cst_17 : f32 to vector<2x128xf32>
    %21 = arith.addf %20, %19 : vector<2x128xf32>
    %22 = arith.divf %20, %21 : vector<2x128xf32>
    %23 = vector.extract_strided_slice %13 {offsets = [0, 128], sizes = [2, 128], strides = [1, 1]} : vector<2x384xf32> to vector<2x128xf32>
    %24 = vector.extract_strided_slice %14 {offsets = [0, 128], sizes = [2, 128], strides = [1, 1]} : vector<2x384xf32> to vector<2x128xf32>
    %25 = arith.addf %23, %24 : vector<2x128xf32>
    %26 = arith.negf %25 : vector<2x128xf32>
    %27 = math.exp %26 : vector<2x128xf32>
    %cst_18 = arith.constant 1.000000e+00 : f32
    %28 = vector.broadcast %cst_18 : f32 to vector<2x128xf32>
    %29 = arith.addf %28, %27 : vector<2x128xf32>
    %30 = arith.divf %28, %29 : vector<2x128xf32>
    %31 = vector.extract_strided_slice %13 {offsets = [0, 256], sizes = [2, 128], strides = [1, 1]} : vector<2x384xf32> to vector<2x128xf32>
    %32 = vector.extract_strided_slice %14 {offsets = [0, 256], sizes = [2, 128], strides = [1, 1]} : vector<2x384xf32> to vector<2x128xf32>
    %33 = vector.broadcast %11 : vector<1x128xf32> to vector<2x128xf32>
    %34 = arith.addf %32, %33 : vector<2x128xf32>
    %35 = arith.mulf %22, %34 : vector<2x128xf32>
    %36 = arith.addf %31, %35 : vector<2x128xf32>
    %37 = math.tanh %36 : vector<2x128xf32>
    %cst_19 = arith.constant 1.000000e+00 : f32
    %38 = vector.broadcast %cst_19 : f32 to vector<2x128xf32>
    %39 = arith.subf %38, %30 : vector<2x128xf32>
    %40 = arith.mulf %39, %37 : vector<2x128xf32>
    %41 = arith.mulf %30, %12 : vector<2x128xf32>
    %42 = arith.addf %40, %41 : vector<2x128xf32>
    %c0_20 = arith.constant 0 : index
    %c0_21 = arith.constant 0 : index
    %c0_22 = arith.constant 0 : index
    %43 = vector.load %arg6[%c0_20, %c0_21, %c0_22] : memref<8x2x128xf32, #tpu.memory_space<vmem>>, vector<1x2x128xf32>
    %44 = vector.shape_cast %43 : vector<1x2x128xf32> to vector<2x128xf32>
    %45 = vector.shape_cast %42 : vector<2x128xf32> to vector<1x2x128xf32>
    tpu.vector_store %arg6[%c0_20, %c0_21, %c0_22], %45 {strides = array<i32>} : memref<8x2x128xf32, #tpu.memory_space<vmem>>, vector<1x2x128xf32>,
    %c2 = arith.constant 2 : index
    %c0_23 = arith.constant 0 : index
    %46 = vector.load %arg7[%c2, %c0_23] : memref<16x384xf32, #tpu.memory_space<vmem>>, vector<2x384xf32>
    %cst_24 = arith.constant dense<0.000000e+00> : vector<2x384xf32>
    %47 = tpu.matmul %42, %10, %cst_24 {dimension_numbers = #tpu.dot_dimension_numbers<[1], [0], [0], [1], [0, 0, 1, 1], [], []>} : vector<2x128xf32>, vector<128x384xf32>, vector<2x384xf32> -> vector<2x384xf32>
    %48 = vector.extract_strided_slice %46 {offsets = [0, 0], sizes = [2, 128], strides = [1, 1]} : vector<2x384xf32> to vector<2x128xf32>
    %49 = vector.extract_strided_slice %47 {offsets = [0, 0], sizes = [2, 128], strides = [1, 1]} : vector<2x384xf32> to vector<2x128xf32>
    %50 = arith.addf %48, %49 : vector<2x128xf32>
    %51 = arith.negf %50 : vector<2x128xf32>
    %52 = math.exp %51 : vector<2x128xf32>
    %cst_25 = arith.constant 1.000000e+00 : f32
    %53 = vector.broadcast %cst_25 : f32 to vector<2x128xf32>
    %54 = arith.addf %53, %52 : vector<2x128xf32>
    %55 = arith.divf %53, %54 : vector<2x128xf32>
    %56 = vector.extract_strided_slice %46 {offsets = [0, 128], sizes = [2, 128], strides = [1, 1]} : vector<2x384xf32> to vector<2x128xf32>
    %57 = vector.extract_strided_slice %47 {offsets = [0, 128], sizes = [2, 128], strides = [1, 1]} : vector<2x384xf32> to vector<2x128xf32>
    %58 = arith.addf %56, %57 : vector<2x128xf32>
    %59 = arith.negf %58 : vector<2x128xf32>
    %60 = math.exp %59 : vector<2x128xf32>
    %cst_26 = arith.constant 1.000000e+00 : f32
    %61 = vector.broadcast %cst_26 : f32 to vector<2x128xf32>
    %62 = arith.addf %61, %60 : vector<2x128xf32>
    %63 = arith.divf %61, %62 : vector<2x128xf32>
    %64 = vector.extract_strided_slice %46 {offsets = [0, 256], sizes = [2, 128], strides = [1, 1]} : vector<2x384xf32> to vector<2x128xf32>
    %65 = vector.extract_strided_slice %47 {offsets = [0, 256], sizes = [2, 128], strides = [1, 1]} : vector<2x384xf32> to vector<2x128xf32>
    %66 = vector.broadcast %11 : vector<1x128xf32> to vector<2x128xf32>
    %67 = arith.addf %65, %66 : vector<2x128xf32>
    %68 = arith.mulf %55, %67 : vector<2x128xf32>
    %69 = arith.addf %64, %68 : vector<2x128xf32>
    %70 = math.tanh %69 : vector<2x128xf32>
    %cst_27 = arith.constant 1.000000e+00 : f32
    %71 = vector.broadcast %cst_27 : f32 to vector<2x128xf32>
    %72 = arith.subf %71, %63 : vector<2x128xf32>
    %73 = arith.mulf %72, %70 : vector<2x128xf32>
    %74 = arith.mulf %63, %42 : vector<2x128xf32>
    %75 = arith.addf %73, %74 : vector<2x128xf32>
    %c1 = arith.constant 1 : index
    %c0_28 = arith.constant 0 : index
    %c0_29 = arith.constant 0 : index
    %76 = vector.load %arg6[%c1, %c0_28, %c0_29] : memref<8x2x128xf32, #tpu.memory_space<vmem>>, vector<1x2x128xf32>
    %77 = vector.shape_cast %76 : vector<1x2x128xf32> to vector<2x128xf32>
    %78 = vector.shape_cast %75 : vector<2x128xf32> to vector<1x2x128xf32>
    tpu.vector_store %arg6[%c1, %c0_28, %c0_29], %78 {strides = array<i32>} : memref<8x2x128xf32, #tpu.memory_space<vmem>>, vector<1x2x128xf32>,
    %c4 = arith.constant 4 : index
    %c0_30 = arith.constant 0 : index
    %79 = vector.load %arg7[%c4, %c0_30] : memref<16x384xf32, #tpu.memory_space<vmem>>, vector<2x384xf32>
    %cst_31 = arith.constant dense<0.000000e+00> : vector<2x384xf32>
    %80 = tpu.matmul %75, %10, %cst_31 {dimension_numbers = #tpu.dot_dimension_numbers<[1], [0], [0], [1], [0, 0, 1, 1], [], []>} : vector<2x128xf32>, vector<128x384xf32>, vector<2x384xf32> -> vector<2x384xf32>
    %81 = vector.extract_strided_slice %79 {offsets = [0, 0], sizes = [2, 128], strides = [1, 1]} : vector<2x384xf32> to vector<2x128xf32>
    %82 = vector.extract_strided_slice %80 {offsets = [0, 0], sizes = [2, 128], strides = [1, 1]} : vector<2x384xf32> to vector<2x128xf32>
    %83 = arith.addf %81, %82 : vector<2x128xf32>
    %84 = arith.negf %83 : vector<2x128xf32>
    %85 = math.exp %84 : vector<2x128xf32>
    %cst_32 = arith.constant 1.000000e+00 : f32
    %86 = vector.broadcast %cst_32 : f32 to vector<2x128xf32>
    %87 = arith.addf %86, %85 : vector<2x128xf32>
    %88 = arith.divf %86, %87 : vector<2x128xf32>
    %89 = vector.extract_strided_slice %79 {offsets = [0, 128], sizes = [2, 128], strides = [1, 1]} : vector<2x384xf32> to vector<2x128xf32>
    %90 = vector.extract_strided_slice %80 {offsets = [0, 128], sizes = [2, 128], strides = [1, 1]} : vector<2x384xf32> to vector<2x128xf32>
    %91 = arith.addf %89, %90 : vector<2x128xf32>
    %92 = arith.negf %91 : vector<2x128xf32>
    %93 = math.exp %92 : vector<2x128xf32>
    %cst_33 = arith.constant 1.000000e+00 : f32
    %94 = vector.broadcast %cst_33 : f32 to vector<2x128xf32>
    %95 = arith.addf %94, %93 : vector<2x128xf32>
    %96 = arith.divf %94, %95 : vector<2x128xf32>
    %97 = vector.extract_strided_slice %79 {offsets = [0, 256], sizes = [2, 128], strides = [1, 1]} : vector<2x384xf32> to vector<2x128xf32>
    %98 = vector.extract_strided_slice %80 {offsets = [0, 256], sizes = [2, 128], strides = [1, 1]} : vector<2x384xf32> to vector<2x128xf32>
    %99 = vector.broadcast %11 : vector<1x128xf32> to vector<2x128xf32>
    %100 = arith.addf %98, %99 : vector<2x128xf32>
    %101 = arith.mulf %88, %100 : vector<2x128xf32>
    %102 = arith.addf %97, %101 : vector<2x128xf32>
    %103 = math.tanh %102 : vector<2x128xf32>
    %cst_34 = arith.constant 1.000000e+00 : f32
    %104 = vector.broadcast %cst_34 : f32 to vector<2x128xf32>
    %105 = arith.subf %104, %96 : vector<2x128xf32>
    %106 = arith.mulf %105, %103 : vector<2x128xf32>
    %107 = arith.mulf %96, %75 : vector<2x128xf32>
    %108 = arith.addf %106, %107 : vector<2x128xf32>
    %c2_35 = arith.constant 2 : index
    %c0_36 = arith.constant 0 : index
    %c0_37 = arith.constant 0 : index
    %109 = vector.load %arg6[%c2_35, %c0_36, %c0_37] : memref<8x2x128xf32, #tpu.memory_space<vmem>>, vector<1x2x128xf32>
    %110 = vector.shape_cast %109 : vector<1x2x128xf32> to vector<2x128xf32>
    %111 = vector.shape_cast %108 : vector<2x128xf32> to vector<1x2x128xf32>
    tpu.vector_store %arg6[%c2_35, %c0_36, %c0_37], %111 {strides = array<i32>} : memref<8x2x128xf32, #tpu.memory_space<vmem>>, vector<1x2x128xf32>,
    %c6 = arith.constant 6 : index
    %c0_38 = arith.constant 0 : index
    %112 = vector.load %arg7[%c6, %c0_38] : memref<16x384xf32, #tpu.memory_space<vmem>>, vector<2x384xf32>
    %cst_39 = arith.constant dense<0.000000e+00> : vector<2x384xf32>
    %113 = tpu.matmul %108, %10, %cst_39 {dimension_numbers = #tpu.dot_dimension_numbers<[1], [0], [0], [1], [0, 0, 1, 1], [], []>} : vector<2x128xf32>, vector<128x384xf32>, vector<2x384xf32> -> vector<2x384xf32>
    %114 = vector.extract_strided_slice %112 {offsets = [0, 0], sizes = [2, 128], strides = [1, 1]} : vector<2x384xf32> to vector<2x128xf32>
    %115 = vector.extract_strided_slice %113 {offsets = [0, 0], sizes = [2, 128], strides = [1, 1]} : vector<2x384xf32> to vector<2x128xf32>
    %116 = arith.addf %114, %115 : vector<2x128xf32>
    %117 = arith.negf %116 : vector<2x128xf32>
    %118 = math.exp %117 : vector<2x128xf32>
    %cst_40 = arith.constant 1.000000e+00 : f32
    %119 = vector.broadcast %cst_40 : f32 to vector<2x128xf32>
    %120 = arith.addf %119, %118 : vector<2x128xf32>
    %121 = arith.divf %119, %120 : vector<2x128xf32>
    %122 = vector.extract_strided_slice %112 {offsets = [0, 128], sizes = [2, 128], strides = [1, 1]} : vector<2x384xf32> to vector<2x128xf32>
    %123 = vector.extract_strided_slice %113 {offsets = [0, 128], sizes = [2, 128], strides = [1, 1]} : vector<2x384xf32> to vector<2x128xf32>
    %124 = arith.addf %122, %123 : vector<2x128xf32>
    %125 = arith.negf %124 : vector<2x128xf32>
    %126 = math.exp %125 : vector<2x128xf32>
    %cst_41 = arith.constant 1.000000e+00 : f32
    %127 = vector.broadcast %cst_41 : f32 to vector<2x128xf32>
    %128 = arith.addf %127, %126 : vector<2x128xf32>
    %129 = arith.divf %127, %128 : vector<2x128xf32>
    %130 = vector.extract_strided_slice %112 {offsets = [0, 256], sizes = [2, 128], strides = [1, 1]} : vector<2x384xf32> to vector<2x128xf32>
    %131 = vector.extract_strided_slice %113 {offsets = [0, 256], sizes = [2, 128], strides = [1, 1]} : vector<2x384xf32> to vector<2x128xf32>
    %132 = vector.broadcast %11 : vector<1x128xf32> to vector<2x128xf32>
    %133 = arith.addf %131, %132 : vector<2x128xf32>
    %134 = arith.mulf %121, %133 : vector<2x128xf32>
    %135 = arith.addf %130, %134 : vector<2x128xf32>
    %136 = math.tanh %135 : vector<2x128xf32>
    %cst_42 = arith.constant 1.000000e+00 : f32
    %137 = vector.broadcast %cst_42 : f32 to vector<2x128xf32>
    %138 = arith.subf %137, %129 : vector<2x128xf32>
    %139 = arith.mulf %138, %136 : vector<2x128xf32>
    %140 = arith.mulf %129, %108 : vector<2x128xf32>
    %141 = arith.addf %139, %140 : vector<2x128xf32>
    %c3 = arith.constant 3 : index
    %c0_43 = arith.constant 0 : index
    %c0_44 = arith.constant 0 : index
    %142 = vector.load %arg6[%c3, %c0_43, %c0_44] : memref<8x2x128xf32, #tpu.memory_space<vmem>>, vector<1x2x128xf32>
    %143 = vector.shape_cast %142 : vector<1x2x128xf32> to vector<2x128xf32>
    %144 = vector.shape_cast %141 : vector<2x128xf32> to vector<1x2x128xf32>
    tpu.vector_store %arg6[%c3, %c0_43, %c0_44], %144 {strides = array<i32>} : memref<8x2x128xf32, #tpu.memory_space<vmem>>, vector<1x2x128xf32>,
    %c8 = arith.constant 8 : index
    %c0_45 = arith.constant 0 : index
    %145 = vector.load %arg7[%c8, %c0_45] : memref<16x384xf32, #tpu.memory_space<vmem>>, vector<2x384xf32>
    %cst_46 = arith.constant dense<0.000000e+00> : vector<2x384xf32>
    %146 = tpu.matmul %141, %10, %cst_46 {dimension_numbers = #tpu.dot_dimension_numbers<[1], [0], [0], [1], [0, 0, 1, 1], [], []>} : vector<2x128xf32>, vector<128x384xf32>, vector<2x384xf32> -> vector<2x384xf32>
    %147 = vector.extract_strided_slice %145 {offsets = [0, 0], sizes = [2, 128], strides = [1, 1]} : vector<2x384xf32> to vector<2x128xf32>
    %148 = vector.extract_strided_slice %146 {offsets = [0, 0], sizes = [2, 128], strides = [1, 1]} : vector<2x384xf32> to vector<2x128xf32>
    %149 = arith.addf %147, %148 : vector<2x128xf32>
    %150 = arith.negf %149 : vector<2x128xf32>
    %151 = math.exp %150 : vector<2x128xf32>
    %cst_47 = arith.constant 1.000000e+00 : f32
    %152 = vector.broadcast %cst_47 : f32 to vector<2x128xf32>
    %153 = arith.addf %152, %151 : vector<2x128xf32>
    %154 = arith.divf %152, %153 : vector<2x128xf32>
    %155 = vector.extract_strided_slice %145 {offsets = [0, 128], sizes = [2, 128], strides = [1, 1]} : vector<2x384xf32> to vector<2x128xf32>
    %156 = vector.extract_strided_slice %146 {offsets = [0, 128], sizes = [2, 128], strides = [1, 1]} : vector<2x384xf32> to vector<2x128xf32>
    %157 = arith.addf %155, %156 : vector<2x128xf32>
    %158 = arith.negf %157 : vector<2x128xf32>
    %159 = math.exp %158 : vector<2x128xf32>
    %cst_48 = arith.constant 1.000000e+00 : f32
    %160 = vector.broadcast %cst_48 : f32 to vector<2x128xf32>
    %161 = arith.addf %160, %159 : vector<2x128xf32>
    %162 = arith.divf %160, %161 : vector<2x128xf32>
    %163 = vector.extract_strided_slice %145 {offsets = [0, 256], sizes = [2, 128], strides = [1, 1]} : vector<2x384xf32> to vector<2x128xf32>
    %164 = vector.extract_strided_slice %146 {offsets = [0, 256], sizes = [2, 128], strides = [1, 1]} : vector<2x384xf32> to vector<2x128xf32>
    %165 = vector.broadcast %11 : vector<1x128xf32> to vector<2x128xf32>
    %166 = arith.addf %164, %165 : vector<2x128xf32>
    %167 = arith.mulf %154, %166 : vector<2x128xf32>
    %168 = arith.addf %163, %167 : vector<2x128xf32>
    %169 = math.tanh %168 : vector<2x128xf32>
    %cst_49 = arith.constant 1.000000e+00 : f32
    %170 = vector.broadcast %cst_49 : f32 to vector<2x128xf32>
    %171 = arith.subf %170, %162 : vector<2x128xf32>
    %172 = arith.mulf %171, %169 : vector<2x128xf32>
    %173 = arith.mulf %162, %141 : vector<2x128xf32>
    %174 = arith.addf %172, %173 : vector<2x128xf32>
    %c4_50 = arith.constant 4 : index
    %c0_51 = arith.constant 0 : index
    %c0_52 = arith.constant 0 : index
    %175 = vector.load %arg6[%c4_50, %c0_51, %c0_52] : memref<8x2x128xf32, #tpu.memory_space<vmem>>, vector<1x2x128xf32>
    %176 = vector.shape_cast %175 : vector<1x2x128xf32> to vector<2x128xf32>
    %177 = vector.shape_cast %174 : vector<2x128xf32> to vector<1x2x128xf32>
    tpu.vector_store %arg6[%c4_50, %c0_51, %c0_52], %177 {strides = array<i32>} : memref<8x2x128xf32, #tpu.memory_space<vmem>>, vector<1x2x128xf32>,
    %c10 = arith.constant 10 : index
    %c0_53 = arith.constant 0 : index
    %178 = vector.load %arg7[%c10, %c0_53] : memref<16x384xf32, #tpu.memory_space<vmem>>, vector<2x384xf32>
    %cst_54 = arith.constant dense<0.000000e+00> : vector<2x384xf32>
    %179 = tpu.matmul %174, %10, %cst_54 {dimension_numbers = #tpu.dot_dimension_numbers<[1], [0], [0], [1], [0, 0, 1, 1], [], []>} : vector<2x128xf32>, vector<128x384xf32>, vector<2x384xf32> -> vector<2x384xf32>
    %180 = vector.extract_strided_slice %178 {offsets = [0, 0], sizes = [2, 128], strides = [1, 1]} : vector<2x384xf32> to vector<2x128xf32>
    %181 = vector.extract_strided_slice %179 {offsets = [0, 0], sizes = [2, 128], strides = [1, 1]} : vector<2x384xf32> to vector<2x128xf32>
    %182 = arith.addf %180, %181 : vector<2x128xf32>
    %183 = arith.negf %182 : vector<2x128xf32>
    %184 = math.exp %183 : vector<2x128xf32>
    %cst_55 = arith.constant 1.000000e+00 : f32
    %185 = vector.broadcast %cst_55 : f32 to vector<2x128xf32>
    %186 = arith.addf %185, %184 : vector<2x128xf32>
    %187 = arith.divf %185, %186 : vector<2x128xf32>
    %188 = vector.extract_strided_slice %178 {offsets = [0, 128], sizes = [2, 128], strides = [1, 1]} : vector<2x384xf32> to vector<2x128xf32>
    %189 = vector.extract_strided_slice %179 {offsets = [0, 128], sizes = [2, 128], strides = [1, 1]} : vector<2x384xf32> to vector<2x128xf32>
    %190 = arith.addf %188, %189 : vector<2x128xf32>
    %191 = arith.negf %190 : vector<2x128xf32>
    %192 = math.exp %191 : vector<2x128xf32>
    %cst_56 = arith.constant 1.000000e+00 : f32
    %193 = vector.broadcast %cst_56 : f32 to vector<2x128xf32>
    %194 = arith.addf %193, %192 : vector<2x128xf32>
    %195 = arith.divf %193, %194 : vector<2x128xf32>
    %196 = vector.extract_strided_slice %178 {offsets = [0, 256], sizes = [2, 128], strides = [1, 1]} : vector<2x384xf32> to vector<2x128xf32>
    %197 = vector.extract_strided_slice %179 {offsets = [0, 256], sizes = [2, 128], strides = [1, 1]} : vector<2x384xf32> to vector<2x128xf32>
    %198 = vector.broadcast %11 : vector<1x128xf32> to vector<2x128xf32>
    %199 = arith.addf %197, %198 : vector<2x128xf32>
    %200 = arith.mulf %187, %199 : vector<2x128xf32>
    %201 = arith.addf %196, %200 : vector<2x128xf32>
    %202 = math.tanh %201 : vector<2x128xf32>
    %cst_57 = arith.constant 1.000000e+00 : f32
    %203 = vector.broadcast %cst_57 : f32 to vector<2x128xf32>
    %204 = arith.subf %203, %195 : vector<2x128xf32>
    %205 = arith.mulf %204, %202 : vector<2x128xf32>
    %206 = arith.mulf %195, %174 : vector<2x128xf32>
    %207 = arith.addf %205, %206 : vector<2x128xf32>
    %c5 = arith.constant 5 : index
    %c0_58 = arith.constant 0 : index
    %c0_59 = arith.constant 0 : index
    %208 = vector.load %arg6[%c5, %c0_58, %c0_59] : memref<8x2x128xf32, #tpu.memory_space<vmem>>, vector<1x2x128xf32>
    %209 = vector.shape_cast %208 : vector<1x2x128xf32> to vector<2x128xf32>
    %210 = vector.shape_cast %207 : vector<2x128xf32> to vector<1x2x128xf32>
    tpu.vector_store %arg6[%c5, %c0_58, %c0_59], %210 {strides = array<i32>} : memref<8x2x128xf32, #tpu.memory_space<vmem>>, vector<1x2x128xf32>,
    %c12 = arith.constant 12 : index
    %c0_60 = arith.constant 0 : index
    %211 = vector.load %arg7[%c12, %c0_60] : memref<16x384xf32, #tpu.memory_space<vmem>>, vector<2x384xf32>
    %cst_61 = arith.constant dense<0.000000e+00> : vector<2x384xf32>
    %212 = tpu.matmul %207, %10, %cst_61 {dimension_numbers = #tpu.dot_dimension_numbers<[1], [0], [0], [1], [0, 0, 1, 1], [], []>} : vector<2x128xf32>, vector<128x384xf32>, vector<2x384xf32> -> vector<2x384xf32>
    %213 = vector.extract_strided_slice %211 {offsets = [0, 0], sizes = [2, 128], strides = [1, 1]} : vector<2x384xf32> to vector<2x128xf32>
    %214 = vector.extract_strided_slice %212 {offsets = [0, 0], sizes = [2, 128], strides = [1, 1]} : vector<2x384xf32> to vector<2x128xf32>
    %215 = arith.addf %213, %214 : vector<2x128xf32>
    %216 = arith.negf %215 : vector<2x128xf32>
    %217 = math.exp %216 : vector<2x128xf32>
    %cst_62 = arith.constant 1.000000e+00 : f32
    %218 = vector.broadcast %cst_62 : f32 to vector<2x128xf32>
    %219 = arith.addf %218, %217 : vector<2x128xf32>
    %220 = arith.divf %218, %219 : vector<2x128xf32>
    %221 = vector.extract_strided_slice %211 {offsets = [0, 128], sizes = [2, 128], strides = [1, 1]} : vector<2x384xf32> to vector<2x128xf32>
    %222 = vector.extract_strided_slice %212 {offsets = [0, 128], sizes = [2, 128], strides = [1, 1]} : vector<2x384xf32> to vector<2x128xf32>
    %223 = arith.addf %221, %222 : vector<2x128xf32>
    %224 = arith.negf %223 : vector<2x128xf32>
    %225 = math.exp %224 : vector<2x128xf32>
    %cst_63 = arith.constant 1.000000e+00 : f32
    %226 = vector.broadcast %cst_63 : f32 to vector<2x128xf32>
    %227 = arith.addf %226, %225 : vector<2x128xf32>
    %228 = arith.divf %226, %227 : vector<2x128xf32>
    %229 = vector.extract_strided_slice %211 {offsets = [0, 256], sizes = [2, 128], strides = [1, 1]} : vector<2x384xf32> to vector<2x128xf32>
    %230 = vector.extract_strided_slice %212 {offsets = [0, 256], sizes = [2, 128], strides = [1, 1]} : vector<2x384xf32> to vector<2x128xf32>
    %231 = vector.broadcast %11 : vector<1x128xf32> to vector<2x128xf32>
    %232 = arith.addf %230, %231 : vector<2x128xf32>
    %233 = arith.mulf %220, %232 : vector<2x128xf32>
    %234 = arith.addf %229, %233 : vector<2x128xf32>
    %235 = math.tanh %234 : vector<2x128xf32>
    %cst_64 = arith.constant 1.000000e+00 : f32
    %236 = vector.broadcast %cst_64 : f32 to vector<2x128xf32>
    %237 = arith.subf %236, %228 : vector<2x128xf32>
    %238 = arith.mulf %237, %235 : vector<2x128xf32>
    %239 = arith.mulf %228, %207 : vector<2x128xf32>
    %240 = arith.addf %238, %239 : vector<2x128xf32>
    %c6_65 = arith.constant 6 : index
    %c0_66 = arith.constant 0 : index
    %c0_67 = arith.constant 0 : index
    %241 = vector.load %arg6[%c6_65, %c0_66, %c0_67] : memref<8x2x128xf32, #tpu.memory_space<vmem>>, vector<1x2x128xf32>
    %242 = vector.shape_cast %241 : vector<1x2x128xf32> to vector<2x128xf32>
    %243 = vector.shape_cast %240 : vector<2x128xf32> to vector<1x2x128xf32>
    tpu.vector_store %arg6[%c6_65, %c0_66, %c0_67], %243 {strides = array<i32>} : memref<8x2x128xf32, #tpu.memory_space<vmem>>, vector<1x2x128xf32>,
    %c14 = arith.constant 14 : index
    %c0_68 = arith.constant 0 : index
    %244 = vector.load %arg7[%c14, %c0_68] : memref<16x384xf32, #tpu.memory_space<vmem>>, vector<2x384xf32>
    %cst_69 = arith.constant dense<0.000000e+00> : vector<2x384xf32>
    %245 = tpu.matmul %240, %10, %cst_69 {dimension_numbers = #tpu.dot_dimension_numbers<[1], [0], [0], [1], [0, 0, 1, 1], [], []>} : vector<2x128xf32>, vector<128x384xf32>, vector<2x384xf32> -> vector<2x384xf32>
    %246 = vector.extract_strided_slice %244 {offsets = [0, 0], sizes = [2, 128], strides = [1, 1]} : vector<2x384xf32> to vector<2x128xf32>
    %247 = vector.extract_strided_slice %245 {offsets = [0, 0], sizes = [2, 128], strides = [1, 1]} : vector<2x384xf32> to vector<2x128xf32>
    %248 = arith.addf %246, %247 : vector<2x128xf32>
    %249 = arith.negf %248 : vector<2x128xf32>
    %250 = math.exp %249 : vector<2x128xf32>
    %cst_70 = arith.constant 1.000000e+00 : f32
    %251 = vector.broadcast %cst_70 : f32 to vector<2x128xf32>
    %252 = arith.addf %251, %250 : vector<2x128xf32>
    %253 = arith.divf %251, %252 : vector<2x128xf32>
    %254 = vector.extract_strided_slice %244 {offsets = [0, 128], sizes = [2, 128], strides = [1, 1]} : vector<2x384xf32> to vector<2x128xf32>
    %255 = vector.extract_strided_slice %245 {offsets = [0, 128], sizes = [2, 128], strides = [1, 1]} : vector<2x384xf32> to vector<2x128xf32>
    %256 = arith.addf %254, %255 : vector<2x128xf32>
    %257 = arith.negf %256 : vector<2x128xf32>
    %258 = math.exp %257 : vector<2x128xf32>
    %cst_71 = arith.constant 1.000000e+00 : f32
    %259 = vector.broadcast %cst_71 : f32 to vector<2x128xf32>
    %260 = arith.addf %259, %258 : vector<2x128xf32>
    %261 = arith.divf %259, %260 : vector<2x128xf32>
    %262 = vector.extract_strided_slice %244 {offsets = [0, 256], sizes = [2, 128], strides = [1, 1]} : vector<2x384xf32> to vector<2x128xf32>
    %263 = vector.extract_strided_slice %245 {offsets = [0, 256], sizes = [2, 128], strides = [1, 1]} : vector<2x384xf32> to vector<2x128xf32>
    %264 = vector.broadcast %11 : vector<1x128xf32> to vector<2x128xf32>
    %265 = arith.addf %263, %264 : vector<2x128xf32>
    %266 = arith.mulf %253, %265 : vector<2x128xf32>
    %267 = arith.addf %262, %266 : vector<2x128xf32>
    %268 = math.tanh %267 : vector<2x128xf32>
    %cst_72 = arith.constant 1.000000e+00 : f32
    %269 = vector.broadcast %cst_72 : f32 to vector<2x128xf32>
    %270 = arith.subf %269, %261 : vector<2x128xf32>
    %271 = arith.mulf %270, %268 : vector<2x128xf32>
    %272 = arith.mulf %261, %240 : vector<2x128xf32>
    %273 = arith.addf %271, %272 : vector<2x128xf32>
    %c7 = arith.constant 7 : index
    %c0_73 = arith.constant 0 : index
    %c0_74 = arith.constant 0 : index
    %274 = vector.load %arg6[%c7, %c0_73, %c0_74] : memref<8x2x128xf32, #tpu.memory_space<vmem>>, vector<1x2x128xf32>
    %275 = vector.shape_cast %274 : vector<1x2x128xf32> to vector<2x128xf32>
    %276 = vector.shape_cast %273 : vector<2x128xf32> to vector<1x2x128xf32>
    tpu.vector_store %arg6[%c7, %c0_73, %c0_74], %276 {strides = array<i32>} : memref<8x2x128xf32, #tpu.memory_space<vmem>>, vector<1x2x128xf32>,
    %c0_75 = arith.constant 0 : index
    %c0_76 = arith.constant 0 : index
    %277 = vector.load %arg8[%c0_75, %c0_76] : memref<2x128xf32, #tpu.memory_space<vmem>>, vector<2x128xf32>
    tpu.vector_store %arg8[%c0_75, %c0_76], %273 {strides = array<i32>} : memref<2x128xf32, #tpu.memory_space<vmem>>, vector<2x128xf32>,
    return
  }
  func.func @transform_0(%arg0: i32) -> (i32, i32) {
    %c0_i32 = arith.constant 0 : i32
    %c0_i32_0 = arith.constant 0 : i32
    return %arg0, %c0_i32 : i32, i32
  }
  func.func @transform_1(%arg0: i32) -> (i32, i32) {
    %c0_i32 = arith.constant 0 : i32
    %c0_i32_0 = arith.constant 0 : i32
    %c0_i32_1 = arith.constant 0 : i32
    return %c0_i32, %c0_i32_0 : i32, i32
  }
  func.func @transform_2(%arg0: i32) -> (i32, i32) {
    %c0_i32 = arith.constant 0 : i32
    %c0_i32_0 = arith.constant 0 : i32
    %c0_i32_1 = arith.constant 0 : i32
    return %c0_i32, %c0_i32_0 : i32, i32
  }
  func.func @transform_3(%arg0: i32) -> (i32, i32) {
    %c0_i32 = arith.constant 0 : i32
    %c0_i32_0 = arith.constant 0 : i32
    %c0_i32_1 = arith.constant 0 : i32
    return %c0_i32, %c0_i32_0 : i32, i32
  }
  func.func @transform_4(%arg0: i32) -> (i32, i32) {
    %c0_i32 = arith.constant 0 : i32
    %c0_i32_0 = arith.constant 0 : i32
    %c0_i32_1 = arith.constant 0 : i32
    return %c0_i32, %c0_i32_0 : i32, i32
  }
  func.func @transform_5(%arg0: i32) -> (i32, i32, i32) {
    %c0_i32 = arith.constant 0 : i32
    %c0_i32_0 = arith.constant 0 : i32
    %c0_i32_1 = arith.constant 0 : i32
    return %arg0, %c0_i32, %c0_i32_0 : i32, i32, i32
  }
}

</mosaic_0001>

<bundles_post_ra>
// kernel: basebone_forward.1
= control target key start
LH: loop header
LB: loop body
LE: loop exit
PB: predicated region body
PF: predicated region fallthrough
CT: control target
= control target key end

     0   :  { %v2756_v3 = vmov 0.0   ;;  %vm68_vm0 = vcmask 523264   ;;  %vm2758_vm1 = vmmov 0   ;;  %s3423_s1 = inlined_call_operand.vmem [shape: f32[64,384], index: 1, kind: input, shape index: {}]   ;;  %s3424_s0 = inlined_call_operand.vmem [shape: f32[16,64], index: 0, kind: input, shape index: {}]   ;;  %s3425_s2 = inlined_call_operand.vmem [shape: f32[128,384], index: 2, kind: input, shape index: {}]   ;;  %s3426_s3 = inlined_call_operand.vmem [shape: f32[1,384], index: 3, kind: input, shape index: {}]   ;;  %s3427_s4 = inlined_call_operand.vmem [shape: f32[1,128], index: 4, kind: input, shape index: {}]   ;;  %s3428_s5 = inlined_call_operand.vmem [shape: f32[8,2,128], index: 5, kind: output, shape index: {}]  }
   0x1   :  { %v28_v0 = vld [vmem:[%s3423_s1 + $0x8] sm:$0xff]  ;;  %v31_v1 = vld [vmem:[%s3423_s1 + $0x20] sm:$0xff]  ;;  %139 = vmatprep.mubr.f32.mxu0 %v2756_v3  ;;  %24 = vst [vmem:[#allocation3] sm:$0x3] %v2756_v3  ;;  %v30_v5 = vld [vmem:[%s3423_s1 + $0x18] sm:$0xff] }
   0x2   :  { %v27_v2 = vld [vmem:[%s3423_s1] sm:$0xff]  ;;  %v2193_v4 = vpack.c.bf16 %v31_v1, %v28_v0  ;;  %v34_v6 = vld [vmem:[%s3423_s1 + $0x38] sm:$0xff]  ;;  %v37_v7 = vld [vmem:[%s3423_s1 + $0x50] sm:$0xff] }
   0x3   :  { %v2195_v8 = vpack.c.bf16 %v30_v5, %v27_v2  ;;  %v2197_v9 = vpack.c.bf16 %v37_v7, %v34_v6  ;;  %v33_v10 = vld [vmem:[%s3423_s1 + $0x30] sm:$0xff]  ;;  %v36_v11 = vld [vmem:[%s3423_s1 + $0x48] sm:$0xff]  ;;  %v43_v13 = vld [vmem:[%s3423_s1 + $0x80] sm:$0xff] }
   0x4   :  { %v40_v12 = vld [vmem:[%s3423_s1 + $0x68] sm:$0xff]  ;;  %2194 = vmatprep.subr.bf16.mxu0 %v2193_v4  ;;  %v2199_v14 = vpack.c.bf16 %v36_v11, %v33_v10  ;;  %v39_v16 = vld [vmem:[%s3423_s1 + $0x60] sm:$0xff]  ;;  %v42_v17 = vld [vmem:[%s3423_s1 + $0x78] sm:$0xff]  ;;  %v2757_v4 = vmov 0.0|0.0  }
   0x5   :  { %2196 = vmatpush1.bf16.msra.mxu0 %v2195_v8  ;;  %v2201_v15 = vpack.c.bf16 %v43_v13, %v40_v12  ;;  %v25_v18 = vld [vmem:[%s3424_s0] sm:$0xff]  ;;  %v46_v19 = vld [vmem:[%s3423_s1 + $0x98] sm:$0xff]  ;;  %v49_v20 = vld [vmem:[%s3423_s1 + $0xb0] sm:$0xff]  ;;  %v2203_v21 = vpack.c.bf16 %v42_v17, %v39_v16 }
   0x6   :  { %2198 = vmatprep.subr.bf16.mxu0 %v2197_v9  ;;  %1910 = vmatprep.mubr.msk.f32.mxu1 %vm68_vm0, %v25_v18  ;;  %v45_v22 = vld [vmem:[%s3423_s1 + $0x90] sm:$0xff]  ;;  %v2205_v23 = vpack.c.bf16 %v49_v20, %v46_v19  ;;  %v48_v24 = vld [vmem:[%s3423_s1 + $0xa8] sm:$0xff]  ;;  %v237_v28 = vld [vmem:[%s3425_s2 + $0x20] sm:$0xff] }
   0x7   :  { %v29_v25 = vld [vmem:[%s3423_s1 + $0x10] sm:$0xff]  ;;  %v32_v26 = vld [vmem:[%s3423_s1 + $0x28] sm:$0xff]  ;;  %v35_v30 = vld [vmem:[%s3423_s1 + $0x40] sm:$0xff]  ;;  %v2207_v32 = vpack.c.bf16 %v48_v24, %v45_v22 }
   0x8   :  { %v234_v27 = vld [vmem:[%s3425_s2 + $0x8] sm:$0xff]  ;;  %v2209_v29 = vpack.c.bf16 %v32_v26, %v29_v25  ;;  %v38_v31 = vld [vmem:[%s3423_s1 + $0x58] sm:$0xff]  ;;  %v233_v33 = vld [vmem:[%s3425_s2] sm:$0xff] }
   0x9   :  { %2200 = vmatpush1.bf16.msra.mxu0 %v2199_v14  ;;  %v2213_v34 = vpack.c.bf16 %v38_v31, %v35_v30  ;;  %v2864_v35 = vpack.c.bf16 %v237_v28, %v234_v27  ;;  %v236_v36 = vld [vmem:[%s3425_s2 + $0x18] sm:$0xff]  ;;  %v41_v37 = vld [vmem:[%s3423_s1 + $0x70] sm:$0xff]  ;;  %v44_v38 = vld [vmem:[%s3423_s1 + $0x88] sm:$0xff] }
   0xa   :  { %2202 = vmatprep.subr.bf16.mxu0 %v2201_v15  ;;  %2210 = vmatprep.subr.bf16.mxu1 %v2209_v29  ;;  %v240_v39 = vld [vmem:[%s3425_s2 + $0x38] sm:$0xff]  ;;  %v243_v40 = vld [vmem:[%s3425_s2 + $0x50] sm:$0xff]  ;;  %v2217_v41 = vpack.c.bf16 %v44_v38, %v41_v37  ;;  %v47_v42 = vld [vmem:[%s3423_s1 + $0xa0] sm:$0xff]  ;;  %v2887_v44 = vpack.c.bf16 %v236_v36, %v233_v33 }
   0xb   :  { %2212 = vmatpush3.bf16.msra.mxu1 %v2209_v29  ;;  %v50_v43 = vld [vmem:[%s3423_s1 + $0xb8] sm:$0xff]  ;;  %v2890_v45 = vpack.c.bf16 %v243_v40, %v240_v39  ;;  %v239_v46 = vld [vmem:[%s3425_s2 + $0x30] sm:$0xff]  ;;  %v242_v47 = vld [vmem:[%s3425_s2 + $0x48] sm:$0xff] }
   0xc   :  { %2214 = vmatprep.subr.bf16.mxu1 %v2213_v34  ;;  %v246_v48 = vld [vmem:[%s3425_s2 + $0x68] sm:$0xff]  ;;  %v249_v49 = vld [vmem:[%s3425_s2 + $0x80] sm:$0xff]  ;;  %v2221_v50 = vpack.c.bf16 %v50_v43, %v47_v42  ;;  %v2906_v51 = vpack.c.bf16 %v242_v47, %v239_v46  ;;  %v248_v55 = vld [vmem:[%s3425_s2 + $0x78] sm:$0xff] }
   0xd   :  { %2204 = vmatpush1.bf16.msra.mxu0 %v2203_v21  ;;  %v26_v52 = vld [vmem:[%s3424_s0 + $0x8] sm:$0xff]  ;;  %v2913_v53 = vpack.c.bf16 %v249_v49, %v246_v48  ;;  %v245_v54 = vld [vmem:[%s3425_s2 + $0x60] sm:$0xff]  ;;  %v252_v56 = vld [vmem:[%s3425_s2 + $0x98] sm:$0xff] }
   0xe   :  { %2206 = vmatprep.subr.bf16.mxu0 %v2205_v23  ;;  %v255_v57 = vld [vmem:[%s3425_s2 + $0xb0] sm:$0xff]  ;;  %v238_v59 = vld [vmem:[%s3425_s2 + $0x28] sm:$0xff]  ;;  %v2935_v60 = vpack.c.bf16 %v248_v55, %v245_v54  ;;  %v261_v2 = vld [vmem:[%s3425_s2 + $0xe0] sm:$0xff]  ;;  %v53_v55 = vlaneseq }
   0xf   :  { %2216 = vmatpush3.bf16.msra.mxu1 %v2213_v34  ;;  %v235_v58 = vld [vmem:[%s3425_s2 + $0x10] sm:$0xff]  ;;  %v2939_v61 = vpack.c.bf16 %v255_v57, %v252_v56  ;;  %v254_v63 = vld [vmem:[%s3425_s2 + $0xa8] sm:$0xff]  ;;  %v241_v5 = vld [vmem:[%s3425_s2 + $0x40] sm:$0xff] }
  0x10   :  { %2218 = vmatprep.subr.bf16.mxu1 %v2217_v41  ;;  %v251_v62 = vld [vmem:[%s3425_s2 + $0x90] sm:$0xff]  ;;  %v258_v0 = vld [vmem:[%s3425_s2 + $0xc8] sm:$0xff]  ;;  %v2950_v1 = vpack.c.bf16 %v238_v59, %v235_v58  ;;  %v244_v6 = vld [vmem:[%s3425_s2 + $0x58] sm:$0xff]  ;;  %v54_v56 = vshrl.u32 %v53_v55, 7 }
  0x11   :  { %2208 = vmatpush1.bf16.msra.mxu0 %v2207_v32  ;;  %v2963_v7 = vpack.c.bf16 %v254_v63, %v251_v62  ;;  %v2967_v8 = vpack.c.bf16 %v261_v2, %v258_v0  ;;  %v257_v9 = vld [vmem:[%s3425_s2 + $0xc0] sm:$0xff]  ;;  %v260_v10 = vld [vmem:[%s3425_s2 + $0xd8] sm:$0xff]  ;;  %v2979_v12 = vpack.c.bf16 %v244_v6, %v241_v5  ;;  %v267_v13 = vld [vmem:[%s3425_s2 + $0x110] sm:$0xff] }
  0x12   :  { %2226 = vmatprep.subr.bf16.mxu0 %v2864_v35  ;;  %v264_v11 = vld [vmem:[%s3425_s2 + $0xf8] sm:$0xff]  ;;  %v247_v14 = vld [vmem:[%s3425_s2 + $0x70] sm:$0xff]  ;;  %v250_v15 = vld [vmem:[%s3425_s2 + $0x88] sm:$0xff]  ;;  %v2994_v16 = vpack.c.bf16 %v260_v10, %v257_v9  ;;  %v55_v57 = vsub.s32 0, %v54_v56  ;;  %v59_v59 = vsub.s32 1, %v54_v56  ;;  %v63_v9 = vsub.s32 2, %v54_v56 }
  0x13   :  { %2220 = vmatpush3.bf16.msra.mxu1 %v2217_v41  ;;  %v2997_v17 = vpack.c.bf16 %v267_v13, %v264_v11  ;;  %v266_v19 = vld [vmem:[%s3425_s2 + $0x108] sm:$0xff]  ;;  %v3009_v21 = vpack.c.bf16 %v250_v15, %v247_v14  ;;  %v273_v22 = vld [vmem:[%s3425_s2 + $0x140] sm:$0xff]  ;;  %v256_v24 = vld [vmem:[%s3425_s2 + $0xb8] sm:$0xff] }
  0x14   :  { %1720 = vmatmul.mubr.msk.f32.vlgmr.msra.gmra.mrb[0].mxu0 %vm68_vm0, %v25_v18  ;;  %2222 = vmatprep.subr.bf16.mxu1 %v2221_v50  ;;  %v263_v18 = vld [vmem:[%s3425_s2 + $0xf0] sm:$0xff]  ;;  %v270_v20 = vld [vmem:[%s3425_s2 + $0x128] sm:$0xff]  ;;  %v253_v23 = vld [vmem:[%s3425_s2 + $0xa0] sm:$0xff] }
  0x15   :  { %2228 = vmatpush1.bf16.msra.mxu0 %v2887_v44  ;;  %145 = vmatprep.mubr.f32.mxu0 %v2756_v3  ;;  %v3022_v25 = vpack.c.bf16 %v266_v19, %v263_v18  ;;  %v3025_v26 = vpack.c.bf16 %v273_v22, %v270_v20  ;;  %v269_v27 = vld [vmem:[%s3425_s2 + $0x120] sm:$0xff]  ;;  %v272_v28 = vld [vmem:[%s3425_s2 + $0x138] sm:$0xff]  ;;  %v3037_v30 = vpack.c.bf16 %v256_v24, %v253_v23  ;;  %v279_v31 = vld [vmem:[%s3425_s2 + $0x170] sm:$0xff] }
  0x16   :  { %2230 = vmatprep.subr.bf16.mxu0 %v2890_v45  ;;  %v276_v29 = vld [vmem:[%s3425_s2 + $0x158] sm:$0xff]  ;;  %v259_v32 = vld [vmem:[%s3425_s2 + $0xd0] sm:$0xff]  ;;  %v262_v33 = vld [vmem:[%s3425_s2 + $0xe8] sm:$0xff]  ;;  %v3050_v34 = vpack.c.bf16 %v272_v28, %v269_v27 }
  0x17   :  { %2224 = vmatpush3.bf16.msra.mxu1 %v2221_v50  ;;  %v3053_v36 = vpack.c.bf16 %v279_v31, %v276_v29  ;;  %v275_v37 = vld [vmem:[%s3425_s2 + $0x150] sm:$0xff]  ;;  %v278_v38 = vld [vmem:[%s3425_s2 + $0x168] sm:$0xff]  ;;  %v3062_v39 = vpack.c.bf16 %v262_v33, %v259_v32  ;;  %v265_v40 = vld [vmem:[%s3425_s2 + $0x100] sm:$0xff] }
  0x18   :  { %1721 = vmatmul.mubr.msk.f32.gmra.mrb[2].mxu0 %vm68_vm0, %v26_v52  ;;  %2257 = vmatprep.subr.bf16.mxu1 %v2757_v4  ;;  %v268_v41 = vld [vmem:[%s3425_s2 + $0x118] sm:$0xff]  ;;  %v3072_v42 = vpack.c.bf16 %v278_v38, %v275_v37  ;;  %v271_v46 = vld [vmem:[%s3425_s2 + $0x130] sm:$0xff]  ;;  %v274_v47 = vld [vmem:[%s3425_s2 + $0x148] sm:$0xff] }
  0x19   :  { %2232 = vmatpush1.bf16.msra.mxu0 %v2906_v51  ;;  %350 = vmatprep.mubr.f32.mxu0 %v2756_v3  ;;  %v3076_v43 = vpack.c.bf16 %v268_v41, %v265_v40  ;;  %v3086_v48 = vld [vmem:[#allocation3] sm:$0x3]  ;;  %v3089_v49 = vpack.c.bf16 %v274_v47, %v271_v46  ;;  %v277_v50 = vld [vmem:[%s3425_s2 + $0x160] sm:$0xff] }
  0x1a   :  { %2234 = vmatprep.subr.bf16.mxu0 %v2913_v53  ;;  %1911 = vmatmul.mubr.msk.f32.vlgmr.msra.gmra.mrb[0].mxu1 %vm68_vm0, %v26_v52  ;;  %v280_v52 = vld [vmem:[%s3425_s2 + $0x178] sm:$0xff]  ;;  %v51_v58 = vld [vmem:[%s3426_s3] sm:$0x7] }
  0x1b   :  { %2259 = vmatpush3.bf16.msra.mxu1 %v2950_v1  ;;  %1945 = vmatprep.mubr.msk.f32.mxu1 %vm2758_vm1, %v2756_v3  ;;  %v3103_v54 = vpack.c.bf16 %v280_v52, %v277_v50  ;;  %v56_v62 = vrot.slane %v51_v58, %v55_v57  ;;  %v60_v63 = vrot.slane %v51_v58, %v59_v59  ;;  %v3148_v47 = vld [vmem:[%s3427_s4] ss:$0 sm:$0xff] }
  0x1c   :  { %2260 = vmatprep.subr.bf16.mxu1 %v2757_v4  ;;  %v64_v14 = vrot.slane %v51_v58, %v63_v9 }
  0x1d   :  { %2236 = vmatpush1.bf16.msra.mxu0 %v2935_v60 }
  0x1e   :  { %2238 = vmatprep.subr.bf16.mxu0 %v2939_v61 }
  0x1f   :  { %2262 = vmatpush3.bf16.msra.mxu1 %v2979_v12 }
  0x20   :  { %2263 = vmatprep.subr.bf16.mxu1 %v2757_v4 }
  0x21   :  { %2240 = vmatpush1.bf16.msra.mxu0 %v2963_v7 }
  0x22   :  { %2242 = vmatprep.subr.bf16.mxu0 %v2967_v8 }
  0x23   :  { %2265 = vmatpush3.bf16.msra.mxu1 %v3009_v21 }
  0x24   :  { %2266 = vmatprep.subr.bf16.mxu1 %v2757_v4 }
  0x25   :  { %2244 = vmatpush1.bf16.msra.mxu0 %v2994_v16 }
  0x26   :  { %2246 = vmatprep.subr.bf16.mxu0 %v2997_v17 }
  0x27   :  { %2268 = vmatpush3.bf16.msra.mxu1 %v3037_v30 }
  0x28   :  { %2269 = vmatprep.subr.bf16.mxu1 %v2757_v4 }
  0x29   :  { %2248 = vmatpush1.bf16.msra.mxu0 %v3022_v25 }
  0x2a   :  { %2250 = vmatprep.subr.bf16.mxu0 %v3025_v26 }
  0x2b   :  { %2271 = vmatpush3.bf16.msra.mxu1 %v3062_v39 }
  0x2c   :  { %2272 = vmatprep.subr.bf16.mxu1 %v2757_v4 }
  0x2d   :  { %2252 = vmatpush1.bf16.msra.mxu0 %v3050_v34 }
  0x2e   :  { %2254 = vmatprep.subr.bf16.mxu0 %v3053_v36 }
  0x2f   :  { %2274 = vmatpush3.bf16.msra.mxu1 %v3076_v43 }
  0x30   :  { %2275 = vmatprep.subr.bf16.mxu1 %v2757_v4 }
  0x31   :  { %2256 = vmatpush1.bf16.msra.mxu0 %v3072_v42 }
  0x32   :  { %2282 = vmatprep.subr.bf16.mxu0 %v2864_v35 }
  0x33   :  { %2277 = vmatpush3.bf16.msra.mxu1 %v3089_v49 }
  0x34   :  { %351 = vmatmul.mubr.f32.vlgmr.msra.gmra.mrb[4].mxu0 %v3086_v48  ;;  %2278 = vmatprep.subr.bf16.mxu1 %v2757_v4 }
  0x35   :  { %2284 = vmatpush1.bf16.msra.mxu0 %v2887_v44  ;;  %523 = vmatprep.mubr.f32.mxu0 %v2756_v3 }
  0x36   :  { %2286 = vmatprep.subr.bf16.mxu0 %v2890_v45 }
  0x37   :  { %2280 = vmatpush3.bf16.msra.mxu1 %v3103_v54 }
  0x38   :  { %2313 = vmatprep.subr.bf16.mxu1 %v2757_v4 }
  0x39   :  { %2288 = vmatpush1.bf16.msra.mxu0 %v2906_v51 }
  0x3a   :  { %2290 = vmatprep.subr.bf16.mxu0 %v2913_v53  ;;  %1946 = vmatmul.mubr.f32.vlgmr.msra.gmra.mrb[2].mxu1 %v3086_v48 }
  0x3b   :  { %2315 = vmatpush3.bf16.msra.mxu1 %v2950_v1  ;;  %1980 = vmatprep.mubr.msk.f32.mxu1 %vm2758_vm1, %v2756_v3 }
  0x3c   :  { %2316 = vmatprep.subr.bf16.mxu1 %v2757_v4 }
  0x3d   :  { %2292 = vmatpush1.bf16.msra.mxu0 %v2935_v60 }
  0x3e   :  { %2294 = vmatprep.subr.bf16.mxu0 %v2939_v61 }
  0x3f   :  { %2318 = vmatpush3.bf16.msra.mxu1 %v2979_v12 }
  0x40   :  { %2319 = vmatprep.subr.bf16.mxu1 %v2757_v4 }
  0x41   :  { %2296 = vmatpush1.bf16.msra.mxu0 %v2963_v7 }
  0x42   :  { %2298 = vmatprep.subr.bf16.mxu0 %v2967_v8 }
  0x43   :  { %2321 = vmatpush3.bf16.msra.mxu1 %v3009_v21 }
  0x44   :  { %2322 = vmatprep.subr.bf16.mxu1 %v2757_v4 }
  0x45   :  { %2300 = vmatpush1.bf16.msra.mxu0 %v2994_v16 }
  0x46   :  { %2302 = vmatprep.subr.bf16.mxu0 %v2997_v17 }
  0x47   :  { %2324 = vmatpush3.bf16.msra.mxu1 %v3037_v30 }
  0x48   :  { %2325 = vmatprep.subr.bf16.mxu1 %v2757_v4 }
  0x49   :  { %2304 = vmatpush1.bf16.msra.mxu0 %v3022_v25 }
  0x4a   :  { %2306 = vmatprep.subr.bf16.mxu0 %v3025_v26 }
  0x4b   :  { %2327 = vmatpush3.bf16.msra.mxu1 %v3062_v39 }
  0x4c   :  { %2328 = vmatprep.subr.bf16.mxu1 %v2757_v4 }
  0x4d   :  { %2308 = vmatpush1.bf16.msra.mxu0 %v3050_v34 }
  0x4e   :  { %2310 = vmatprep.subr.bf16.mxu0 %v3053_v36 }
  0x4f   :  { %2330 = vmatpush3.bf16.msra.mxu1 %v3076_v43 }
  0x50   :  { %2331 = vmatprep.subr.bf16.mxu1 %v2757_v4 }
  0x51   :  { %2312 = vmatpush1.bf16.msra.mxu0 %v3072_v42 }
  0x52   :  { %2338 = vmatprep.subr.bf16.mxu0 %v2864_v35 }
  0x53   :  { %2333 = vmatpush3.bf16.msra.mxu1 %v3089_v49 }
  0x54   :  { %2334 = vmatprep.subr.bf16.mxu1 %v2757_v4 }
  0x57   :  { %2336 = vmatpush3.bf16.msra.mxu1 %v3103_v54 }
  0x58   :  { %2369 = vmatprep.subr.bf16.mxu1 %v2757_v4 }
  0xe7   :  { %v141_v0 = vpop.f32.mrb[0].mxu0 }
  0xe8   :  { %v142_v2 = vadd.f32 %v141_v0, %v56_v62  ;;  %v143_v5 = vpop.f32.mrb[1].mxu0 }
  0xe9   :  { %v144_v6 = vadd.f32 %v143_v5, %v60_v63 }
  0xea   :  { %227 = vst [vmem:[#allocation2] sm:$0xff] %v142_v2 }
  0xeb   :  { %228 = vst [vmem:[#allocation2 + $0x8] sm:$0xff] %v144_v6  ;;  %v147_v10 = vpop.f32.mrb[2].mxu0 }
  0xec   :  { %v148_v11 = vadd.f32 %v147_v10, %v56_v62  ;;  %v149_v13 = vpop.f32.mrb[3].mxu0 }
  0xed   :  { %v150_v15 = vadd.f32 %v149_v13, %v60_v63  ;;  %v1912_v18 = vpop.f32.mrb[0].mxu1 }
  0xee   :  { %230 = vst [vmem:[#allocation2 + $0x18] sm:$0xff] %v148_v11  ;;  %v224_v19 = vadd.f32 %v1912_v18, %v64_v14  ;;  %v218_v20 = vpop.f32.mrb[1].mxu1 }
  0xef   :  { %231 = vst [vmem:[#allocation2 + $0x20] sm:$0xff] %v150_v15  ;;  %v219_v22 = vadd.f32 %v218_v20, %v64_v14 }
  0xf0   :  { %232 = vst [vmem:[#allocation2 + $0x28] sm:$0xff] %v224_v19 }
  0xf1   :  { %229 = vst [vmem:[#allocation2 + $0x10] sm:$0xff] %v219_v22  ;;  %v283_v23 = vld [vmem:[#allocation2] sm:$0x3]  ;;  %v456_v13 = vld [vmem:[#allocation2] sm:$0xc] }
  0xf2   :  { %v284_v31 = vld [vmem:[#allocation2 + $0x8] sm:$0x3]  ;;  %v457_v18 = vld [vmem:[#allocation2 + $0x8] sm:$0xc] }
  0xf8   :  { %v285_v57 = vld [vmem:[#allocation2 + $0x10] sm:$0x3] }
 0x107   :  { %v352_v24 = vpop.f32.mrb[4].mxu0 }
 0x108   :  { %v427_v27 = vadd.f32 %v352_v24, %v283_v23  ;;  %v354_v28 = vpop.f32.mrb[5].mxu0 }
 0x109   :  { %v434_v32 = vadd.f32 %v354_v28, %v284_v31 }
 0x10a   :  { %v1724_v29 = vmul.f32 -1.442695, %v427_v27 }
 0x10b   :  { %v1725_v33 = vmul.f32 -1.442695, %v434_v32 }
 0x10c   :  { %2676 = vpow2.f32 %v1724_v29 }
 0x10d   :  { %v423_v37 = vpop.f32.mrb[2].mxu1  ;;  %2678 = vpow2.f32 %v1725_v33 }
 0x10e   :  { %v1947_v38 = vpop.f32.mrb[3].mxu1  ;;  %v447_v52 = vadd.f32 %v3148_v47, %v423_v37 }
 0x116   :  { %v2677_v40 = vpop.eup %2676 }
 0x117   :  { %v431_v41 = vadd.f32 1.0, %v2677_v40  ;;  %v2679_v46 = vpop.eup %2678  ;;  %v458_v40 = vld [vmem:[#allocation2 + $0x10] sm:$0xc] }
 0x118   :  { %v438_v50 = vadd.f32 1.0, %v2679_v46 }
 0x119   :  { %2680 = vrcp.f32 %v431_v41 }
 0x11a   :  { %2682 = vrcp.f32 %v438_v50 }
 0x123   :  { %v2681_v55 = vpop.eup %2680 }
 0x124   :  { %v448_v56 = vmul.f32 %v2681_v55, %v447_v52  ;;  %v2683_v59 = vpop.eup %2682 }
 0x125   :  { %v451_v62 = vsub.f32 1.0, %v2683_v59  ;;  %v453_v2 = vmul.f32 %v2683_v59, %v3086_v48 }
 0x126   :  { %v449_v58 = vadd.f32 %v448_v56, %v285_v57 }
 0x128   :  { %2684 = vtanh.f32 %v449_v58 }
 0x132   :  { %v2685_v63 = vpop.eup %2684 }
 0x133   :  { %v452_v0 = vmul.f32 %v2685_v63, %v451_v62 }
 0x135   :  { %v3152_v5 = vadd.f32 %v453_v2, %v452_v0  ;;  %v636_v2 = vld [vmem:[#allocation2] sm:$0x30] }
 0x137   :  { %455 = vst [vmem:[%s3428_s5] sm:$0x3] %v3152_v5  ;;  %524 = vmatmul.mubr.f32.vlgmr.msra.gmra.mrb[6].mxu0 %v3152_v5  ;;  %1981 = vmatmul.mubr.f32.vlgmr.msra.gmra.mrb[4].mxu1 %v3152_v5  ;;  %v630_v33 = vrot.slane %v3152_v5, 6 }
 0x138   :  { %2340 = vmatpush1.bf16.msra.mxu0 %v2887_v44  ;;  %2371 = vmatpush3.bf16.msra.mxu1 %v2950_v1 }
 0x139   :  { %2342 = vmatprep.subr.bf16.mxu0 %v2890_v45  ;;  %2372 = vmatprep.subr.bf16.mxu1 %v2757_v4 }
 0x13a   :  { %706 = vmatprep.mubr.f32.mxu0 %v2756_v3  ;;  %2015 = vmatprep.mubr.msk.f32.mxu1 %vm2758_vm1, %v2756_v3 }
 0x13c   :  { %2344 = vmatpush1.bf16.msra.mxu0 %v2906_v51  ;;  %2374 = vmatpush3.bf16.msra.mxu1 %v2979_v12 }
 0x13d   :  { %2346 = vmatprep.subr.bf16.mxu0 %v2913_v53  ;;  %2375 = vmatprep.subr.bf16.mxu1 %v2757_v4 }
 0x140   :  { %2348 = vmatpush1.bf16.msra.mxu0 %v2935_v60  ;;  %2377 = vmatpush3.bf16.msra.mxu1 %v3009_v21 }
 0x141   :  { %2350 = vmatprep.subr.bf16.mxu0 %v2939_v61  ;;  %2378 = vmatprep.subr.bf16.mxu1 %v2757_v4 }
 0x144   :  { %2352 = vmatpush1.bf16.msra.mxu0 %v2963_v7  ;;  %2380 = vmatpush3.bf16.msra.mxu1 %v3037_v30 }
 0x145   :  { %2354 = vmatprep.subr.bf16.mxu0 %v2967_v8  ;;  %2381 = vmatprep.subr.bf16.mxu1 %v2757_v4 }
 0x148   :  { %2356 = vmatpush1.bf16.msra.mxu0 %v2994_v16  ;;  %2383 = vmatpush3.bf16.msra.mxu1 %v3062_v39 }
 0x149   :  { %2358 = vmatprep.subr.bf16.mxu0 %v2997_v17  ;;  %2384 = vmatprep.subr.bf16.mxu1 %v2757_v4 }
 0x14c   :  { %2360 = vmatpush1.bf16.msra.mxu0 %v3022_v25  ;;  %2386 = vmatpush3.bf16.msra.mxu1 %v3076_v43 }
 0x14d   :  { %2362 = vmatprep.subr.bf16.mxu0 %v3025_v26  ;;  %2387 = vmatprep.subr.bf16.mxu1 %v2757_v4 }
 0x150   :  { %2364 = vmatpush1.bf16.msra.mxu0 %v3050_v34  ;;  %2389 = vmatpush3.bf16.msra.mxu1 %v3089_v49 }
 0x151   :  { %2366 = vmatprep.subr.bf16.mxu0 %v3053_v36  ;;  %2390 = vmatprep.subr.bf16.mxu1 %v2757_v4 }
 0x154   :  { %2368 = vmatpush1.bf16.msra.mxu0 %v3072_v42  ;;  %2392 = vmatpush3.bf16.msra.mxu1 %v3103_v54 }
 0x155   :  { %2394 = vmatprep.subr.bf16.mxu0 %v2864_v35  ;;  %2425 = vmatprep.subr.bf16.mxu1 %v2757_v4 }
 0x20a   :  { %v525_v48 = vpop.f32.mrb[6].mxu0  ;;  %v596_v6 = vpop.f32.mrb[4].mxu1 }
 0x20b   :  { %v601_v9 = vrot.slane %v525_v48, 6  ;;  %v527_v10 = vpop.f32.mrb[7].mxu0  ;;  %v1982_v11 = vpop.f32.mrb[5].mxu1  ;;  %v620_v29 = vadd.f32 %v3148_v47, %v596_v6  ;;  %v637_v6 = vld [vmem:[#allocation2 + $0x8] sm:$0x30] }
 0x20c   :  { %v611_v14 = vrot.slane %v527_v10, 6 }
 0x20d   :  { %v603_v15 = vadd.f32 %v601_v9, %v456_v13  ;;  %v622_v31 = vrot.slane %v620_v29, 6 }
 0x20e   :  { %v613_v19 = vadd.f32 %v611_v14, %v457_v18 }
 0x20f   :  { %v1727_v20 = vmul.f32 -1.442695, %v603_v15 }
 0x210   :  { %v1728_v22 = vmul.f32 -1.442695, %v613_v19 }
 0x211   :  { %2686 = vpow2.f32 %v1727_v20 }
 0x212   :  { %2688 = vpow2.f32 %v1728_v22 }
 0x21b   :  { %v2687_v23 = vpop.eup %2686 }
 0x21c   :  { %v2689_v24 = vpop.eup %2688  ;;  %v607_v27 = vadd.f32 1.0, %v2687_v23 }
 0x21d   :  { %v617_v28 = vadd.f32 1.0, %v2689_v24 }
 0x21e   :  { %2690 = vrcp.f32 %v607_v27 }
 0x21f   :  { %2692 = vrcp.f32 %v617_v28  ;;  %v638_v28 = vld [vmem:[#allocation2 + $0x10] sm:$0x30] }
 0x228   :  { %v2691_v32 = vpop.eup %2690 }
 0x229   :  { %v2693_v37 = vpop.eup %2692  ;;  %v624_v38 = vmul.f32 %v2691_v32, %v622_v31 }
 0x22a   :  { %v632_v41 = vmul.f32 %v2693_v37, %v630_v33  ;;  %v627_v50 = vsub.f32 1.0, %v2693_v37 }
 0x22b   :  { %v625_v46 = vadd.f32 %v624_v38, %v458_v40 }
 0x22d   :  { %2694 = vtanh.f32 %v625_v46 }
 0x237   :  { %v2695_v52 = vpop.eup %2694 }
 0x238   :  { %v628_v55 = vmul.f32 %v2695_v52, %v627_v50 }
 0x23a   :  { %v3197_v56 = vadd.f32 %v632_v41, %v628_v55 }
 0x23c   :  { %1729 = vst [vmem:[%s3428_s5] sm:$0xc] %v3197_v56  ;;  %v640_v57 = vrot.slane %v3197_v56, 2  ;;  %v812_v23 = vrot.slane %v3197_v56, 6  ;;  %v818_v56 = vld [vmem:[#allocation2] sm:$0xc0] }
 0x23e   :  { %707 = vmatmul.mubr.f32.vlgmr.msra.gmra.mrb[8].mxu0 %v640_v57  ;;  %2016 = vmatmul.mubr.f32.vlgmr.msra.gmra.mrb[6].mxu1 %v640_v57 }
 0x23f   :  { %2396 = vmatpush1.bf16.msra.mxu0 %v2887_v44  ;;  %2427 = vmatpush3.bf16.msra.mxu1 %v2950_v1 }
 0x240   :  { %2398 = vmatprep.subr.bf16.mxu0 %v2890_v45  ;;  %2428 = vmatprep.subr.bf16.mxu1 %v2757_v4 }
 0x241   :  { %888 = vmatprep.mubr.f32.mxu0 %v2756_v3  ;;  %2050 = vmatprep.mubr.msk.f32.mxu1 %vm2758_vm1, %v2756_v3 }
 0x243   :  { %2400 = vmatpush1.bf16.msra.mxu0 %v2906_v51  ;;  %2430 = vmatpush3.bf16.msra.mxu1 %v2979_v12 }
 0x244   :  { %2402 = vmatprep.subr.bf16.mxu0 %v2913_v53  ;;  %2431 = vmatprep.subr.bf16.mxu1 %v2757_v4 }
 0x247   :  { %2404 = vmatpush1.bf16.msra.mxu0 %v2935_v60  ;;  %2433 = vmatpush3.bf16.msra.mxu1 %v3009_v21 }
 0x248   :  { %2406 = vmatprep.subr.bf16.mxu0 %v2939_v61  ;;  %2434 = vmatprep.subr.bf16.mxu1 %v2757_v4 }
 0x24b   :  { %2408 = vmatpush1.bf16.msra.mxu0 %v2963_v7  ;;  %2436 = vmatpush3.bf16.msra.mxu1 %v3037_v30 }
 0x24c   :  { %2410 = vmatprep.subr.bf16.mxu0 %v2967_v8  ;;  %2437 = vmatprep.subr.bf16.mxu1 %v2757_v4 }
 0x24f   :  { %2412 = vmatpush1.bf16.msra.mxu0 %v2994_v16  ;;  %2439 = vmatpush3.bf16.msra.mxu1 %v3062_v39 }
 0x250   :  { %2414 = vmatprep.subr.bf16.mxu0 %v2997_v17  ;;  %2440 = vmatprep.subr.bf16.mxu1 %v2757_v4 }
 0x253   :  { %2416 = vmatpush1.bf16.msra.mxu0 %v3022_v25  ;;  %2442 = vmatpush3.bf16.msra.mxu1 %v3076_v43 }
 0x254   :  { %2418 = vmatprep.subr.bf16.mxu0 %v3025_v26  ;;  %2443 = vmatprep.subr.bf16.mxu1 %v2757_v4 }
 0x257   :  { %2420 = vmatpush1.bf16.msra.mxu0 %v3050_v34  ;;  %2445 = vmatpush3.bf16.msra.mxu1 %v3089_v49 }
 0x258   :  { %2422 = vmatprep.subr.bf16.mxu0 %v3053_v36  ;;  %2446 = vmatprep.subr.bf16.mxu1 %v2757_v4 }
 0x25b   :  { %2424 = vmatpush1.bf16.msra.mxu0 %v3072_v42  ;;  %2448 = vmatpush3.bf16.msra.mxu1 %v3103_v54 }
 0x25c   :  { %2450 = vmatprep.subr.bf16.mxu0 %v2864_v35  ;;  %2481 = vmatprep.subr.bf16.mxu1 %v2757_v4 }
 0x311   :  { %v708_v58 = vpop.f32.mrb[8].mxu0  ;;  %v779_v59 = vpop.f32.mrb[6].mxu1 }
 0x312   :  { %v784_v62 = vrot.slane %v708_v58, 4  ;;  %v710_v63 = vpop.f32.mrb[9].mxu0  ;;  %v2017_v0 = vpop.f32.mrb[7].mxu1  ;;  %v803_v19 = vadd.f32 %v3148_v47, %v779_v59  ;;  %v819_v59 = vld [vmem:[#allocation2 + $0x8] sm:$0xc0] }
 0x313   :  { %v794_v5 = vrot.slane %v710_v63, 4 }
 0x314   :  { %v786_v48 = vadd.f32 %v784_v62, %v636_v2  ;;  %v805_v20 = vrot.slane %v803_v19, 4 }
 0x315   :  { %v796_v9 = vadd.f32 %v794_v5, %v637_v6 }
 0x316   :  { %v1730_v10 = vmul.f32 -1.442695, %v786_v48 }
 0x317   :  { %v1731_v11 = vmul.f32 -1.442695, %v796_v9 }
 0x318   :  { %2696 = vpow2.f32 %v1730_v10 }
 0x319   :  { %2698 = vpow2.f32 %v1731_v11 }
 0x322   :  { %v2697_v13 = vpop.eup %2696 }
 0x323   :  { %v2699_v14 = vpop.eup %2698  ;;  %v790_v15 = vadd.f32 1.0, %v2697_v13 }
 0x324   :  { %v800_v18 = vadd.f32 1.0, %v2699_v14 }
 0x325   :  { %2700 = vrcp.f32 %v790_v15 }
 0x326   :  { %2702 = vrcp.f32 %v800_v18  ;;  %v820_v18 = vld [vmem:[#allocation2 + $0x10] sm:$0xc0] }
 0x32f   :  { %v2701_v22 = vpop.eup %2700 }
 0x330   :  { %v2703_v24 = vpop.eup %2702  ;;  %v807_v27 = vmul.f32 %v2701_v22, %v805_v20 }
 0x331   :  { %v814_v29 = vmul.f32 %v2703_v24, %v812_v23  ;;  %v810_v32 = vsub.f32 1.0, %v2703_v24 }
 0x332   :  { %v808_v31 = vadd.f32 %v807_v27, %v638_v28 }
 0x334   :  { %2704 = vtanh.f32 %v808_v31 }
 0x33e   :  { %v2705_v33 = vpop.eup %2704 }
 0x33f   :  { %v811_v37 = vmul.f32 %v2705_v33, %v810_v32 }
 0x341   :  { %v3241_v38 = vadd.f32 %v814_v29, %v811_v37  ;;  %v1000_v29 = vld [vmem:[#allocation2 + $0x18] sm:$0x3] }
 0x343   :  { %1732 = vst [vmem:[%s3428_s5] sm:$0x30] %v3241_v38  ;;  %v822_v40 = vrot.slane %v3241_v38, 4  ;;  %v994_v13 = vrot.slane %v3241_v38, 6 }
 0x345   :  { %889 = vmatmul.mubr.f32.vlgmr.msra.gmra.mrb[10].mxu0 %v822_v40  ;;  %2051 = vmatmul.mubr.f32.vlgmr.msra.gmra.mrb[8].mxu1 %v822_v40 }
 0x346   :  { %2452 = vmatpush1.bf16.msra.mxu0 %v2887_v44  ;;  %2483 = vmatpush3.bf16.msra.mxu1 %v2950_v1 }
 0x347   :  { %2454 = vmatprep.subr.bf16.mxu0 %v2890_v45  ;;  %2484 = vmatprep.subr.bf16.mxu1 %v2757_v4 }
 0x348   :  { %1070 = vmatprep.mubr.f32.mxu0 %v2756_v3  ;;  %2085 = vmatprep.mubr.msk.f32.mxu1 %vm2758_vm1, %v2756_v3 }
 0x34a   :  { %2456 = vmatpush1.bf16.msra.mxu0 %v2906_v51  ;;  %2486 = vmatpush3.bf16.msra.mxu1 %v2979_v12 }
 0x34b   :  { %2458 = vmatprep.subr.bf16.mxu0 %v2913_v53  ;;  %2487 = vmatprep.subr.bf16.mxu1 %v2757_v4 }
 0x34e   :  { %2460 = vmatpush1.bf16.msra.mxu0 %v2935_v60  ;;  %2489 = vmatpush3.bf16.msra.mxu1 %v3009_v21 }
 0x34f   :  { %2462 = vmatprep.subr.bf16.mxu0 %v2939_v61  ;;  %2490 = vmatprep.subr.bf16.mxu1 %v2757_v4 }
 0x352   :  { %2464 = vmatpush1.bf16.msra.mxu0 %v2963_v7  ;;  %2492 = vmatpush3.bf16.msra.mxu1 %v3037_v30 }
 0x353   :  { %2466 = vmatprep.subr.bf16.mxu0 %v2967_v8  ;;  %2493 = vmatprep.subr.bf16.mxu1 %v2757_v4 }
 0x356   :  { %2468 = vmatpush1.bf16.msra.mxu0 %v2994_v16  ;;  %2495 = vmatpush3.bf16.msra.mxu1 %v3062_v39 }
 0x357   :  { %2470 = vmatprep.subr.bf16.mxu0 %v2997_v17  ;;  %2496 = vmatprep.subr.bf16.mxu1 %v2757_v4 }
 0x35a   :  { %2472 = vmatpush1.bf16.msra.mxu0 %v3022_v25  ;;  %2498 = vmatpush3.bf16.msra.mxu1 %v3076_v43 }
 0x35b   :  { %2474 = vmatprep.subr.bf16.mxu0 %v3025_v26  ;;  %2499 = vmatprep.subr.bf16.mxu1 %v2757_v4 }
 0x35e   :  { %2476 = vmatpush1.bf16.msra.mxu0 %v3050_v34  ;;  %2501 = vmatpush3.bf16.msra.mxu1 %v3089_v49 }
 0x35f   :  { %2478 = vmatprep.subr.bf16.mxu0 %v3053_v36  ;;  %2502 = vmatprep.subr.bf16.mxu1 %v2757_v4 }
 0x362   :  { %2480 = vmatpush1.bf16.msra.mxu0 %v3072_v42  ;;  %2504 = vmatpush3.bf16.msra.mxu1 %v3103_v54 }
 0x363   :  { %2506 = vmatprep.subr.bf16.mxu0 %v2864_v35  ;;  %2537 = vmatprep.subr.bf16.mxu1 %v2757_v4 }
 0x418   :  { %v890_v41 = vpop.f32.mrb[10].mxu0  ;;  %v961_v46 = vpop.f32.mrb[8].mxu1 }
 0x419   :  { %v966_v50 = vrot.slane %v890_v41, 2  ;;  %v892_v52 = vpop.f32.mrb[11].mxu0  ;;  %v2052_v55 = vpop.f32.mrb[9].mxu1  ;;  %v985_v9 = vadd.f32 %v3148_v47, %v961_v46  ;;  %v1001_v41 = vld [vmem:[#allocation2 + $0x20] sm:$0x3] }
 0x41a   :  { %v976_v57 = vrot.slane %v892_v52, 2 }
 0x41b   :  { %v968_v58 = vadd.f32 %v966_v50, %v818_v56  ;;  %v987_v10 = vrot.slane %v985_v9, 2 }
 0x41c   :  { %v978_v62 = vadd.f32 %v976_v57, %v819_v59 }
 0x41d   :  { %v1733_v63 = vmul.f32 -1.442695, %v968_v58 }
 0x41e   :  { %v1734_v0 = vmul.f32 -1.442695, %v978_v62 }
 0x41f   :  { %2706 = vpow2.f32 %v1733_v63  ;;  %v1002_v63 = vld [vmem:[#allocation2 + $0x28] sm:$0x3] }
 0x420   :  { %2708 = vpow2.f32 %v1734_v0 }
 0x429   :  { %v2707_v2 = vpop.eup %2706 }
 0x42a   :  { %v2709_v5 = vpop.eup %2708  ;;  %v972_v48 = vadd.f32 1.0, %v2707_v2 }
 0x42b   :  { %v982_v6 = vadd.f32 1.0, %v2709_v5 }
 0x42c   :  { %2710 = vrcp.f32 %v972_v48 }
 0x42d   :  { %2712 = vrcp.f32 %v982_v6 }
 0x436   :  { %v2711_v11 = vpop.eup %2710 }
 0x437   :  { %v2713_v14 = vpop.eup %2712  ;;  %v989_v15 = vmul.f32 %v2711_v11, %v987_v10 }
 0x438   :  { %v996_v19 = vmul.f32 %v2713_v14, %v994_v13  ;;  %v992_v22 = vsub.f32 1.0, %v2713_v14 }
 0x439   :  { %v990_v20 = vadd.f32 %v989_v15, %v820_v18 }
 0x43b   :  { %2714 = vtanh.f32 %v990_v20 }
 0x445   :  { %v2715_v23 = vpop.eup %2714 }
 0x446   :  { %v993_v24 = vmul.f32 %v2715_v23, %v992_v22  ;;  %v1172_v23 = vld [vmem:[#allocation2 + $0x20] sm:$0xc] }
 0x448   :  { %v997_v27 = vadd.f32 %v996_v19, %v993_v24  ;;  %v1171_v19 = vld [vmem:[#allocation2 + $0x18] sm:$0xc] }
 0x44a   :  { %1735 = vst [vmem:[%s3428_s5] sm:$0xc0] %v997_v27  ;;  %v3288_v28 = vrot.slane %v997_v27, 6 }
 0x44c   :  { %1071 = vmatmul.mubr.f32.vlgmr.msra.gmra.mrb[12].mxu0 %v3288_v28  ;;  %2086 = vmatmul.mubr.f32.vlgmr.msra.gmra.mrb[10].mxu1 %v3288_v28 }
 0x44d   :  { %2508 = vmatpush1.bf16.msra.mxu0 %v2887_v44  ;;  %2539 = vmatpush3.bf16.msra.mxu1 %v2950_v1 }
 0x44e   :  { %2510 = vmatprep.subr.bf16.mxu0 %v2890_v45  ;;  %2540 = vmatprep.subr.bf16.mxu1 %v2757_v4 }
 0x44f   :  { %1238 = vmatprep.mubr.f32.mxu0 %v2756_v3  ;;  %2120 = vmatprep.mubr.msk.f32.mxu1 %vm2758_vm1, %v2756_v3 }
 0x451   :  { %2512 = vmatpush1.bf16.msra.mxu0 %v2906_v51  ;;  %2542 = vmatpush3.bf16.msra.mxu1 %v2979_v12 }
 0x452   :  { %2514 = vmatprep.subr.bf16.mxu0 %v2913_v53  ;;  %2543 = vmatprep.subr.bf16.mxu1 %v2757_v4 }
 0x455   :  { %2516 = vmatpush1.bf16.msra.mxu0 %v2935_v60  ;;  %2545 = vmatpush3.bf16.msra.mxu1 %v3009_v21 }
 0x456   :  { %2518 = vmatprep.subr.bf16.mxu0 %v2939_v61  ;;  %2546 = vmatprep.subr.bf16.mxu1 %v2757_v4 }
 0x459   :  { %2520 = vmatpush1.bf16.msra.mxu0 %v2963_v7  ;;  %2548 = vmatpush3.bf16.msra.mxu1 %v3037_v30 }
 0x45a   :  { %2522 = vmatprep.subr.bf16.mxu0 %v2967_v8  ;;  %2549 = vmatprep.subr.bf16.mxu1 %v2757_v4 }
 0x45d   :  { %2524 = vmatpush1.bf16.msra.mxu0 %v2994_v16  ;;  %2551 = vmatpush3.bf16.msra.mxu1 %v3062_v39 }
 0x45e   :  { %2526 = vmatprep.subr.bf16.mxu0 %v2997_v17  ;;  %2552 = vmatprep.subr.bf16.mxu1 %v2757_v4 }
 0x461   :  { %2528 = vmatpush1.bf16.msra.mxu0 %v3022_v25  ;;  %2554 = vmatpush3.bf16.msra.mxu1 %v3076_v43 }
 0x462   :  { %2530 = vmatprep.subr.bf16.mxu0 %v3025_v26  ;;  %2555 = vmatprep.subr.bf16.mxu1 %v2757_v4 }
 0x465   :  { %2532 = vmatpush1.bf16.msra.mxu0 %v3050_v34  ;;  %2557 = vmatpush3.bf16.msra.mxu1 %v3089_v49 }
 0x466   :  { %2534 = vmatprep.subr.bf16.mxu0 %v3053_v36  ;;  %2558 = vmatprep.subr.bf16.mxu1 %v2757_v4 }
 0x469   :  { %2536 = vmatpush1.bf16.msra.mxu0 %v3072_v42  ;;  %2560 = vmatpush3.bf16.msra.mxu1 %v3103_v54 }
 0x46a   :  { %2562 = vmatprep.subr.bf16.mxu0 %v2864_v35  ;;  %2593 = vmatprep.subr.bf16.mxu1 %v2757_v4 }
 0x51f   :  { %v1072_v31 = vpop.f32.mrb[12].mxu0  ;;  %v1143_v32 = vpop.f32.mrb[10].mxu1 }
 0x520   :  { %v1147_v33 = vadd.f32 %v1072_v31, %v1000_v29  ;;  %v1074_v37 = vpop.f32.mrb[13].mxu0  ;;  %v2087_v38 = vpop.f32.mrb[11].mxu1  ;;  %v1161_v58 = vadd.f32 %v3148_v47, %v1143_v32 }
 0x521   :  { %v1154_v46 = vadd.f32 %v1074_v37, %v1001_v41 }
 0x522   :  { %v1736_v40 = vmul.f32 -1.442695, %v1147_v33 }
 0x523   :  { %v1737_v50 = vmul.f32 -1.442695, %v1154_v46 }
 0x524   :  { %2716 = vpow2.f32 %v1736_v40 }
 0x525   :  { %2718 = vpow2.f32 %v1737_v50  ;;  %v1173_v50 = vld [vmem:[#allocation2 + $0x28] sm:$0xc] }
 0x52e   :  { %v2717_v52 = vpop.eup %2716 }
 0x52f   :  { %v1151_v55 = vadd.f32 1.0, %v2717_v52  ;;  %v2719_v56 = vpop.eup %2718 }
 0x530   :  { %v1158_v57 = vadd.f32 1.0, %v2719_v56 }
 0x531   :  { %2720 = vrcp.f32 %v1151_v55 }
 0x532   :  { %2722 = vrcp.f32 %v1158_v57 }
 0x53b   :  { %v2721_v59 = vpop.eup %2720 }
 0x53c   :  { %v1162_v62 = vmul.f32 %v2721_v59, %v1161_v58  ;;  %v2723_v2 = vpop.eup %2722 }
 0x53d   :  { %v1165_v5 = vsub.f32 1.0, %v2723_v2  ;;  %v1167_v9 = vmul.f32 %v2723_v2, %v3288_v28 }
 0x53e   :  { %v1163_v0 = vadd.f32 %v1162_v62, %v1002_v63 }
 0x540   :  { %2724 = vtanh.f32 %v1163_v0 }
 0x54a   :  { %v2725_v48 = vpop.eup %2724 }
 0x54b   :  { %v1166_v6 = vmul.f32 %v2725_v48, %v1165_v5 }
 0x54d   :  { %v3329_v10 = vadd.f32 %v1167_v9, %v1166_v6 }
 0x54f   :  { %1738 = vst [vmem:[%s3428_s5 + $0x8] sm:$0x3] %v3329_v10  ;;  %1239 = vmatmul.mubr.f32.vlgmr.msra.gmra.mrb[14].mxu0 %v3329_v10  ;;  %2121 = vmatmul.mubr.f32.vlgmr.msra.gmra.mrb[12].mxu1 %v3329_v10  ;;  %v1345_v40 = vrot.slane %v3329_v10, 6 }
 0x550   :  { %2564 = vmatpush1.bf16.msra.mxu0 %v2887_v44  ;;  %2595 = vmatpush3.bf16.msra.mxu1 %v2950_v1 }
 0x551   :  { %2566 = vmatprep.subr.bf16.mxu0 %v2890_v45  ;;  %2596 = vmatprep.subr.bf16.mxu1 %v2757_v4 }
 0x552   :  { %1421 = vmatprep.mubr.f32.mxu0 %v2756_v3  ;;  %2155 = vmatprep.mubr.msk.f32.mxu1 %vm2758_vm1, %v2756_v3 }
 0x554   :  { %2568 = vmatpush1.bf16.msra.mxu0 %v2906_v51  ;;  %2598 = vmatpush3.bf16.msra.mxu1 %v2979_v12 }
 0x555   :  { %2570 = vmatprep.subr.bf16.mxu0 %v2913_v53  ;;  %2599 = vmatprep.subr.bf16.mxu1 %v2757_v4 }
 0x558   :  { %2572 = vmatpush1.bf16.msra.mxu0 %v2935_v60  ;;  %2601 = vmatpush3.bf16.msra.mxu1 %v3009_v21 }
 0x559   :  { %2574 = vmatprep.subr.bf16.mxu0 %v2939_v61  ;;  %2602 = vmatprep.subr.bf16.mxu1 %v2757_v4 }
 0x55c   :  { %2576 = vmatpush1.bf16.msra.mxu0 %v2963_v7  ;;  %2604 = vmatpush3.bf16.msra.mxu1 %v3037_v30 }
 0x55d   :  { %2578 = vmatprep.subr.bf16.mxu0 %v2967_v8  ;;  %2605 = vmatprep.subr.bf16.mxu1 %v2757_v4 }
 0x560   :  { %2580 = vmatpush1.bf16.msra.mxu0 %v2994_v16  ;;  %2607 = vmatpush3.bf16.msra.mxu1 %v3062_v39 }
 0x561   :  { %2582 = vmatprep.subr.bf16.mxu0 %v2997_v17  ;;  %2608 = vmatprep.subr.bf16.mxu1 %v2757_v4 }
 0x564   :  { %2584 = vmatpush1.bf16.msra.mxu0 %v3022_v25  ;;  %2610 = vmatpush3.bf16.msra.mxu1 %v3076_v43 }
 0x565   :  { %2586 = vmatprep.subr.bf16.mxu0 %v3025_v26  ;;  %2611 = vmatprep.subr.bf16.mxu1 %v2757_v4 }
 0x568   :  { %2588 = vmatpush1.bf16.msra.mxu0 %v3050_v34  ;;  %2613 = vmatpush3.bf16.msra.mxu1 %v3089_v49 }
 0x569   :  { %2590 = vmatprep.subr.bf16.mxu0 %v3053_v36  ;;  %2614 = vmatprep.subr.bf16.mxu1 %v2757_v4 }
 0x56c   :  { %2592 = vmatpush1.bf16.msra.mxu0 %v3072_v42  ;;  %2616 = vmatpush3.bf16.msra.mxu1 %v3103_v54 }
 0x56d   :  { %2618 = vmatprep.subr.bf16.mxu0 %v2864_v35  ;;  %2649 = vmatprep.subr.bf16.mxu1 %v2757_v4 }
 0x622   :  { %v1240_v11 = vpop.f32.mrb[14].mxu0  ;;  %v1311_v13 = vpop.f32.mrb[12].mxu1 }
 0x623   :  { %v1316_v14 = vrot.slane %v1240_v11, 6  ;;  %v1242_v15 = vpop.f32.mrb[15].mxu0  ;;  %v2122_v18 = vpop.f32.mrb[13].mxu1  ;;  %v1335_v33 = vadd.f32 %v3148_v47, %v1311_v13 }
 0x624   :  { %v1326_v20 = vrot.slane %v1242_v15, 6 }
 0x625   :  { %v1318_v22 = vadd.f32 %v1316_v14, %v1171_v19  ;;  %v1337_v37 = vrot.slane %v1335_v33, 6  ;;  %v1533_v14 = vld [vmem:[#allocation2 + $0x18] sm:$0xc0]  ;;  %v1534_v19 = vld [vmem:[#allocation2 + $0x20] sm:$0xc0] }
 0x626   :  { %v1328_v24 = vadd.f32 %v1326_v20, %v1172_v23 }
 0x627   :  { %v1739_v27 = vmul.f32 -1.442695, %v1318_v22 }
 0x628   :  { %v1740_v28 = vmul.f32 -1.442695, %v1328_v24 }
 0x629   :  { %2726 = vpow2.f32 %v1739_v27 }
 0x62a   :  { %2728 = vpow2.f32 %v1740_v28 }
 0x633   :  { %v2727_v29 = vpop.eup %2726 }
 0x634   :  { %v2729_v31 = vpop.eup %2728  ;;  %v1322_v32 = vadd.f32 1.0, %v2727_v29 }
 0x635   :  { %v1332_v35 = vadd.f32 1.0, %v2729_v31 }
 0x636   :  { %2730 = vrcp.f32 %v1322_v32 }
 0x637   :  { %2732 = vrcp.f32 %v1332_v35 }
 0x640   :  { %v2731_v38 = vpop.eup %2730 }
 0x641   :  { %v2733_v41 = vpop.eup %2732  ;;  %v1339_v46 = vmul.f32 %v2731_v38, %v1337_v37 }
 0x642   :  { %v1347_v52 = vmul.f32 %v2733_v41, %v1345_v40  ;;  %v1342_v56 = vsub.f32 1.0, %v2733_v41  ;;  %v1535_v40 = vld [vmem:[#allocation2 + $0x28] sm:$0xc0] }
 0x643   :  { %v1340_v55 = vadd.f32 %v1339_v46, %v1173_v50 }
 0x645   :  { %2734 = vtanh.f32 %v1340_v55 }
 0x64f   :  { %v2735_v57 = vpop.eup %2734 }
 0x650   :  { %v1343_v58 = vmul.f32 %v2735_v57, %v1342_v56 }
 0x652   :  { %v3374_v59 = vadd.f32 %v1347_v52, %v1343_v58 }
 0x654   :  { %1741 = vst [vmem:[%s3428_s5 + $0x8] sm:$0xc] %v3374_v59  ;;  %v1355_v62 = vrot.slane %v3374_v59, 2 }
 0x656   :  { %1422 = vmatmul.mubr.f32.vlgmr.msra.gmra.mrb[16].mxu0 %v1355_v62  ;;  %2156 = vmatmul.mubr.f32.vlgmr.msra.gmra.mrb[14].mxu1 %v1355_v62 }
 0x657   :  { %2620 = vmatpush1.bf16.msra.mxu0 %v2887_v44  ;;  %2651 = vmatpush3.bf16.msra.mxu1 %v2950_v1 }
 0x658   :  { %2622 = vmatprep.subr.bf16.mxu0 %v2890_v45  ;;  %2652 = vmatprep.subr.bf16.mxu1 %v2757_v4 }
 0x659   :  { %1603 = vmatprep.mubr.f32.mxu0 %v2756_v3  ;;  %2190 = vmatprep.mubr.msk.f32.mxu1 %vm2758_vm1, %v2756_v3 }
 0x65b   :  { %2624 = vmatpush1.bf16.msra.mxu0 %v2906_v51  ;;  %2654 = vmatpush3.bf16.msra.mxu1 %v2979_v12 }
 0x65c   :  { %2626 = vmatprep.subr.bf16.mxu0 %v2913_v53  ;;  %2655 = vmatprep.subr.bf16.mxu1 %v2757_v4 }
 0x65f   :  { %2628 = vmatpush1.bf16.msra.mxu0 %v2935_v60  ;;  %2657 = vmatpush3.bf16.msra.mxu1 %v3009_v21  ;;  %v1351_v60 = vld [vmem:[#allocation2 + $0x18] sm:$0x30] }
 0x660   :  { %2630 = vmatprep.subr.bf16.mxu0 %v2939_v61  ;;  %2658 = vmatprep.subr.bf16.mxu1 %v2757_v4 }
 0x663   :  { %2632 = vmatpush1.bf16.msra.mxu0 %v2963_v7  ;;  %2660 = vmatpush3.bf16.msra.mxu1 %v3037_v30  ;;  %v1352_v7 = vld [vmem:[#allocation2 + $0x20] sm:$0x30] }
 0x664   :  { %2634 = vmatprep.subr.bf16.mxu0 %v2967_v8  ;;  %2661 = vmatprep.subr.bf16.mxu1 %v2757_v4 }
 0x667   :  { %2636 = vmatpush1.bf16.msra.mxu0 %v2994_v16  ;;  %2663 = vmatpush3.bf16.msra.mxu1 %v3062_v39 }
 0x668   :  { %2638 = vmatprep.subr.bf16.mxu0 %v2997_v17  ;;  %2664 = vmatprep.subr.bf16.mxu1 %v2757_v4 }
 0x66b   :  { %2640 = vmatpush1.bf16.msra.mxu0 %v3022_v25  ;;  %2666 = vmatpush3.bf16.msra.mxu1 %v3076_v43  ;;  %v1353_v43 = vld [vmem:[#allocation2 + $0x28] sm:$0x30] }
 0x66c   :  { %2642 = vmatprep.subr.bf16.mxu0 %v3025_v26  ;;  %2667 = vmatprep.subr.bf16.mxu1 %v2757_v4 }
 0x66f   :  { %2644 = vmatpush1.bf16.msra.mxu0 %v3050_v34  ;;  %2669 = vmatpush3.bf16.msra.mxu1 %v3089_v49 }
 0x670   :  { %2646 = vmatprep.subr.bf16.mxu0 %v3053_v36  ;;  %2670 = vmatprep.subr.bf16.mxu1 %v2757_v4  ;;  %v1527_v36 = vrot.slane %v3374_v59, 6 }
 0x673   :  { %2648 = vmatpush1.bf16.msra.mxu0 %v3072_v42  ;;  %2672 = vmatpush3.bf16.msra.mxu1 %v3103_v54 }
 0x729   :  { %v1423_v3 = vpop.f32.mrb[16].mxu0  ;;  %v1494_v44 = vpop.f32.mrb[14].mxu1 }
 0x72a   :  { %v1499_v45 = vrot.slane %v1423_v3, 4  ;;  %v1425_v51 = vpop.f32.mrb[17].mxu0  ;;  %v2157_v53 = vpop.f32.mrb[15].mxu1  ;;  %v1518_v26 = vadd.f32 %v3148_v47, %v1494_v44 }
 0x72b   :  { %v1509_v61 = vrot.slane %v1425_v51, 4 }
 0x72c   :  { %v1501_v1 = vadd.f32 %v1499_v45, %v1351_v60  ;;  %v1520_v30 = vrot.slane %v1518_v26, 4 }
 0x72d   :  { %v1511_v8 = vadd.f32 %v1509_v61, %v1352_v7 }
 0x72e   :  { %v1742_v12 = vmul.f32 -1.442695, %v1501_v1 }
 0x72f   :  { %v1743_v16 = vmul.f32 -1.442695, %v1511_v8 }
 0x730   :  { %2736 = vpow2.f32 %v1742_v12 }
 0x731   :  { %2738 = vpow2.f32 %v1743_v16 }
 0x73a   :  { %v2737_v17 = vpop.eup %2736 }
 0x73b   :  { %v2739_v4 = vpop.eup %2738  ;;  %v1505_v21 = vadd.f32 1.0, %v2737_v17 }
 0x73c   :  { %v1515_v25 = vadd.f32 1.0, %v2739_v4 }
 0x73d   :  { %2740 = vrcp.f32 %v1505_v21 }
 0x73e   :  { %2742 = vrcp.f32 %v1515_v25 }
 0x747   :  { %v2741_v34 = vpop.eup %2740 }
 0x748   :  { %v2743_v39 = vpop.eup %2742  ;;  %v1522_v42 = vmul.f32 %v2741_v34, %v1520_v30 }
 0x749   :  { %v1529_v49 = vmul.f32 %v2743_v39, %v1527_v36  ;;  %v1525_v63 = vsub.f32 1.0, %v2743_v39 }
 0x74a   :  { %v1523_v54 = vadd.f32 %v1522_v42, %v1353_v43 }
 0x74c   :  { %2744 = vtanh.f32 %v1523_v54 }
 0x756   :  { %v2745_v0 = vpop.eup %2744 }
 0x757   :  { %v1526_v2 = vmul.f32 %v2745_v0, %v1525_v63 }
 0x759   :  { %v1530_v5 = vadd.f32 %v1529_v49, %v1526_v2 }
 0x75b   :  { %1744 = vst [vmem:[%s3428_s5 + $0x8] sm:$0x30] %v1530_v5  ;;  %v1537_v48 = vrot.slane %v1530_v5, 4  ;;  %v1709_v33 = vrot.slane %v1530_v5, 6 }
 0x75d   :  { %1604 = vmatmul.mubr.f32.vlgmr.msra.gmra.mrb[18].mxu0 %v1537_v48  ;;  %2191 = vmatmul.mubr.f32.vlgmr.msra.gmra.mrb[16].mxu1 %v1537_v48 }
 0x830   :  { %v1605_v6 = vpop.f32.mrb[18].mxu0  ;;  %v1676_v9 = vpop.f32.mrb[16].mxu1 }
 0x831   :  { %v1681_v10 = vrot.slane %v1605_v6, 2  ;;  %v1607_v11 = vpop.f32.mrb[19].mxu0  ;;  %v2192_v13 = vpop.f32.mrb[17].mxu1  ;;  %v1700_v31 = vadd.f32 %v3148_v47, %v1676_v9 }
 0x832   :  { %v1691_v15 = vrot.slane %v1607_v11, 2 }
 0x833   :  { %v1683_v18 = vadd.f32 %v1681_v10, %v1533_v14  ;;  %v1702_v32 = vrot.slane %v1700_v31, 2 }
 0x834   :  { %v1693_v20 = vadd.f32 %v1691_v15, %v1534_v19 }
 0x835   :  { %v1745_v22 = vmul.f32 -1.442695, %v1683_v18 }
 0x836   :  { %v1746_v23 = vmul.f32 -1.442695, %v1693_v20 }
 0x837   :  { %2746 = vpow2.f32 %v1745_v22 }
 0x838   :  { %2748 = vpow2.f32 %v1746_v23 }
 0x841   :  { %v2747_v24 = vpop.eup %2746 }
 0x842   :  { %v2749_v27 = vpop.eup %2748  ;;  %v1687_v28 = vadd.f32 1.0, %v2747_v24 }
 0x843   :  { %v1697_v29 = vadd.f32 1.0, %v2749_v27 }
 0x844   :  { %2750 = vrcp.f32 %v1687_v28 }
 0x845   :  { %2752 = vrcp.f32 %v1697_v29 }
 0x84e   :  { %v2751_v35 = vpop.eup %2750 }
 0x84f   :  { %v2753_v37 = vpop.eup %2752  ;;  %v1704_v38 = vmul.f32 %v2751_v35, %v1702_v32 }
 0x850   :  { %v1711_v41 = vmul.f32 %v2753_v37, %v1709_v33  ;;  %v1707_v50 = vsub.f32 1.0, %v2753_v37 }
 0x851   :  { %v1705_v46 = vadd.f32 %v1704_v38, %v1535_v40 }
 0x853   :  { %2754 = vtanh.f32 %v1705_v46 }
 0x85d   :  { %v2755_v52 = vpop.eup %2754 }
 0x85e   :  { %v1708_v55 = vmul.f32 %v2755_v52, %v1707_v50 }
 0x860   :  { %v1712_v56 = vadd.f32 %v1711_v41, %v1708_v55 }
 0x862   :  { %1747 = vst [vmem:[%s3428_s5 + $0x8] sm:$0xc0] %v1712_v56  ;;  %1715 = vst [vmem:[#allocation3 - $0x6] sm:$0xc0] %v1712_v56 }

</bundles_post_ra>
